<compile_context>
chip_gen: v7x
topology: tpu7x:2x2x1
jax: 0.10.0
libtpu: 0.0.40
codegen_flags: <defaults>
</compile_context>

<pallas_src>
import functools

import jax
import jax.numpy as jnp
from jax.experimental import pallas as pl
from jax.experimental.pallas import tpu as pltpu


NUM_BATTERS = 3104
NUM_PITCHERS = 2488
EMB_DIM = 10
OUT_DIM = 2      # real outputs
OUT_SLAB = 8     # stored output width (block last dim == full array last dim)
LAST_N = 128     # lane-aligned width of the last-layer weight / matmul


def _round_up(x, m):
    return (x + m - 1) // m * m


# ------------------------- Pallas kernel (hot path) -------------------------


def _mlp_kernel(num_inner, *refs):
    """h = relu(bact + pact + b1) -> [relu(h@Wi + bi)]* -> relu(h@Wl + bl)[:, :8].

    refs per grid step (batch tile of `tile` rows):
      bact_ref (tile, h_pad) bf16   pact_ref (tile, h_pad) bf16
      b1_ref   (1, h_pad)    f32
      [wi_ref (L, h_pad, h_pad) bf16   bi_ref (L, 1, h_pad) f32]  if num_inner > 0
      wl_ref   (h_pad, LAST_N) bf16    bl_ref (1, LAST_N) f32
      o_ref    (tile, OUT_SLAB) f32
    """
    if num_inner > 0:
        (bact_ref, pact_ref, b1_ref, wi_ref, bi_ref, wl_ref, bl_ref, o_ref) = refs
    else:
        (bact_ref, pact_ref, b1_ref, wl_ref, bl_ref, o_ref) = refs
        wi_ref = bi_ref = None

    # first layer (Linear(20,H) folded into the gathered activation tables):
    # sum + bias + ReLU only -- no MXU work, K=16 matmuls eliminated.
    h = (bact_ref[...].astype(jnp.float32)
         + pact_ref[...].astype(jnp.float32)
         + b1_ref[...])
    h = jnp.maximum(h, 0.0)

    def inner_layer(hh, w, b):
        acc = jnp.dot(hh.astype(w.dtype), w, preferred_element_type=jnp.float32)
        return jnp.maximum(acc + b, 0.0)

    if num_inner > 0:
        if num_inner <= 8:
            # small static layer count: full Python unroll (LLO visibility)
            for l in range(num_inner):
                h = inner_layer(h, wi_ref[l], bi_ref[l])
        else:
            # deep stacks: partial unroll bounds codegen / vreg live ranges
            h = jax.lax.fori_loop(
                0, num_inner,
                lambda l, hh: inner_layer(hh, wi_ref[l], bi_ref[l]),
                h, unroll=2)

    # last: Linear(H, 2) + ReLU (ReLU on the last layer matches the PyTorch
    # module).  Matmul stays on the aligned (h_pad, 128) weight; only the
    # first OUT_SLAB columns are stored (16x less HBM writeback than a 128-wide
    # f32 slab).
    out = jnp.dot(h.astype(wl_ref.dtype), wl_ref[...],
                  preferred_element_type=jnp.float32)
    out = jnp.maximum(out + bl_ref[...], 0.0)
    o_ref[...] = out[:, :OUT_SLAB].astype(o_ref.dtype)


def _run_mlp(bact, pact, params, num_inner, tile):
    """Run the fused MLP over gathered first-layer activations (padded, h_pad)."""
    padded, h_pad = bact.shape

    row_map = lambda i: (i, 0)
    const2 = lambda i: (0, 0)
    const3 = lambda i: (0, 0, 0)

    args = [bact, pact, params["b_first"]]
    in_specs = [
        pl.BlockSpec((tile, h_pad), row_map),
        pl.BlockSpec((tile, h_pad), row_map),
        pl.BlockSpec(params["b_first"].shape, const2),   # VMEM-resident params
    ]
    if num_inner > 0:
        args += [params["w_inner"], params["b_inner"]]
        in_specs += [
            pl.BlockSpec(params["w_inner"].shape, const3),
            pl.BlockSpec(params["b_inner"].shape, const3),
        ]
    args += [params["w_last"], params["b_last"]]
    in_specs += [
        pl.BlockSpec(params["w_last"].shape, const2),
        pl.BlockSpec(params["b_last"].shape, const2),
    ]

    return pl.pallas_call(
        functools.partial(_mlp_kernel, num_inner),
        grid=(padded // tile,),
        out_shape=jax.ShapeDtypeStruct((padded, OUT_SLAB), jnp.float32),
        in_specs=in_specs,
        out_specs=pl.BlockSpec((tile, OUT_SLAB), row_map),
        compiler_params=pltpu.CompilerParams(
            dimension_semantics=("parallel",),       # shard batch tiles on v7x's 2 TCs
            vmem_limit_bytes=32 * 1024 * 1024,       # portable to v7x's 64 MiB VMEM
        ),
    )(*args)


# ------------------------------ Model wrapper --------------------------------


def init_params(key, layers=0, hidden_size=50, param_dtype=jnp.bfloat16):
    """Padded, TPU-friendly parameters matching the PyTorch module's math.

    nn.Embedding -> N(0, 1); nn.Linear -> U(-1/sqrt(fan_in), 1/sqrt(fan_in)).
    The first Linear is folded into per-row activation tables (exact in f32);
    all padding is zero-filled so padded lanes/sublanes contribute nothing.
    """
    h_pad = max(_round_up(hidden_size, 128), 128)
    ks = jax.random.split(key, 8)

    def uniform(k, shape, fan_in):
        bound = float(fan_in) ** -0.5
        return jax.random.uniform(k, shape, jnp.float32, -bound, bound)

    batter_emb = jax.random.normal(ks[0], (NUM_BATTERS, EMB_DIM), jnp.float32)
    pitcher_emb = jax.random.normal(ks[1], (NUM_PITCHERS, EMB_DIM), jnp.float32)

    # first: Linear(20, hidden), folded into the tables (no concat, no K=16 matmul).
    w1 = uniform(ks[2], (2 * EMB_DIM, hidden_size), 2 * EMB_DIM)
    b1 = uniform(ks[3], (hidden_size,), 2 * EMB_DIM)
    bact = batter_emb @ w1[:EMB_DIM]        # (3104, hidden) f32
    pact = pitcher_emb @ w1[EMB_DIM:]       # (2488, hidden) f32
    batter_act = jnp.zeros((NUM_BATTERS, h_pad), param_dtype)
    batter_act = batter_act.at[:, :hidden_size].set(bact.astype(param_dtype))
    pitcher_act = jnp.zeros((NUM_PITCHERS, h_pad), param_dtype)
    pitcher_act = pitcher_act.at[:, :hidden_size].set(pact.astype(param_dtype))
    b_first = jnp.zeros((1, h_pad), jnp.float32).at[0, :hidden_size].set(b1)

    params = {
        "batter_act": batter_act,
        "pitcher_act": pitcher_act,
        "b_first": b_first,
    }

    # inner: layers x Linear(hidden, hidden); biases stored 2-D per layer.
    if layers > 0:
        wi = uniform(ks[4], (layers, hidden_size, hidden_size), hidden_size)
        bi = uniform(ks[5], (layers, hidden_size), hidden_size)
        w_inner = jnp.zeros((layers, h_pad, h_pad), param_dtype)
        w_inner = w_inner.at[:, :hidden_size, :hidden_size].set(wi.astype(param_dtype))
        b_inner = jnp.zeros((layers, 1, h_pad), jnp.float32)
        b_inner = b_inner.at[:, 0, :hidden_size].set(bi)
        params["w_inner"] = w_inner
        params["b_inner"] = b_inner

    # last: Linear(hidden, 2); weight kept lane-aligned (h_pad, 128), zero-padded.
    wl = uniform(ks[6], (hidden_size, OUT_DIM), hidden_size)
    bl = uniform(ks[7], (OUT_DIM,), hidden_size)
    w_last = jnp.zeros((h_pad, LAST_N), param_dtype)
    w_last = w_last.at[:hidden_size, :OUT_DIM].set(wl.astype(param_dtype))
    b_last = jnp.zeros((1, LAST_N), jnp.float32).at[0, :OUT_DIM].set(bl)
    params["w_last"] = w_last
    params["b_last"] = b_last
    return params


def _choose_tile(batch, block_rows):
    """Batch tile: multiple of 16 (bf16 sublane packing); keep >=2 grid steps
    for big batches so v7x's two TensorCores both get work."""
    full = _round_up(batch, 16)
    tile = min(block_rows, full)
    if tile >= full and batch > 256:
        tile = _round_up((full + 1) // 2, 16)
    return max(tile, 16)


def batter_pitcher_forward(params, X, layers, block_rows=512):
    """Forward pass matching BatterPitcherModel.forward.

    X: int32 (batch, 2) with X[:, 0] = batter id, X[:, 1] = pitcher id.
    Returns float32 (batch, 2).
    """
    batch = X.shape[0]
    tile = _choose_tile(batch, block_rows)
    padded = _round_up(batch, tile)

    # Pad the id list (padded rows reuse id 0, their garbage rows are sliced
    # away below), then gather the precomputed first-layer activation rows.
    # TODO(synk): gather stays as XLA glue (see header note).
    Xp = jnp.pad(X, ((0, padded - batch), (0, 0)))
    bact = jnp.take(params["batter_act"], Xp[:, 0], axis=0)    # (padded, h_pad) bf16
    pact = jnp.take(params["pitcher_act"], Xp[:, 1], axis=0)   # (padded, h_pad) bf16

    out_pad = _run_mlp(bact, pact, params, layers, tile)        # (padded, OUT_SLAB) f32
    return out_pad[:batch, :OUT_DIM]


def reference_forward(params, X, layers):
    """Pure-JAX f32 reference on the same (bf16-stored, zero-padded) params."""
    f32 = lambda a: a.astype(jnp.float32)
    h = jnp.maximum(f32(params["batter_act"])[X[:, 0]]
                    + f32(params["pitcher_act"])[X[:, 1]]
                    + params["b_first"], 0.0)
    for l in range(layers):
        h = jnp.maximum(h @ f32(params["w_inner"][l]) + params["b_inner"][l], 0.0)
    out = jnp.maximum(h @ f32(params["w_last"]) + params["b_last"], 0.0)
    return out[:, :OUT_DIM]


# ----------------------------------- main ------------------------------------


if __name__ == "__main__":
    LAYERS = 2
    HIDDEN = 32
    BATCH = 1000          # non-multiple of the tile -> padding + 2-step grid

    key = jax.random.PRNGKey(0)
    k_params, k_b, k_p = jax.random.split(key, 3)

    params = init_params(k_params, layers=LAYERS, hidden_size=HIDDEN,
                         param_dtype=jnp.bfloat16)

    batter_ids = jax.random.randint(k_b, (BATCH,), 0, NUM_BATTERS, dtype=jnp.int32)
    pitcher_ids = jax.random.randint(k_p, (BATCH,), 0, NUM_PITCHERS, dtype=jnp.int32)
    X = jnp.stack([batter_ids, pitcher_ids], axis=1)   # (BATCH, 2) int32

    fwd = jax.jit(functools.partial(batter_pitcher_forward, layers=LAYERS))
    out = jax.block_until_ready(fwd(params, X))         # tile=512, grid=2

    ref = jax.block_until_ready(reference_forward(params, X, LAYERS))

    assert out.shape == (BATCH, OUT_DIM)
    assert bool(jnp.all(jnp.isfinite(out)))
    # bf16 MXU inputs + bf16 inter-layer activations vs f32 reference: loose tol.
    assert jnp.allclose(out, ref, atol=3e-2, rtol=3e-2), "mismatch vs reference"

    print("KERNEL_OK")
</pallas_src>

<mosaic_0001>
module attributes {stable_mosaic.version = 11 : i64} {
  func.func @_mlp_kernel(%arg0: i32, %arg1: memref<512x128xbf16, #tpu.memory_space<vmem>>, %arg2: memref<512x128xbf16, #tpu.memory_space<vmem>>, %arg3: memref<1x128xf32, #tpu.memory_space<vmem>>, %arg4: memref<2x128x128xbf16, #tpu.memory_space<vmem>>, %arg5: memref<2x1x128xf32, #tpu.memory_space<vmem>>, %arg6: memref<128x128xbf16, #tpu.memory_space<vmem>>, %arg7: memref<1x128xf32, #tpu.memory_space<vmem>>, %arg8: memref<512x8xf32, #tpu.memory_space<vmem>>) attributes {dimension_semantics = [#tpu.dimension_semantics<parallel>], iteration_bounds = array<i64: 2>, scalar_prefetch = 0 : i64, scratch_operands = 0 : i64, tpu.core_type = #tpu.core_type<tc>, window_params = [{transform_indices = @transform_0, window_bounds = array<i64: 512, 128>}, {transform_indices = @transform_1, window_bounds = array<i64: 512, 128>}, {pipeline_mode = #tpu.pipeline_mode<synchronous>, transform_indices = @transform_2, window_bounds = array<i64: 1, 128>}, {pipeline_mode = #tpu.pipeline_mode<synchronous>, transform_indices = @transform_3, window_bounds = array<i64: 2, 128, 128>}, {pipeline_mode = #tpu.pipeline_mode<synchronous>, transform_indices = @transform_4, window_bounds = array<i64: 2, 1, 128>}, {pipeline_mode = #tpu.pipeline_mode<synchronous>, transform_indices = @transform_5, window_bounds = array<i64: 128, 128>}, {pipeline_mode = #tpu.pipeline_mode<synchronous>, transform_indices = @transform_6, window_bounds = array<i64: 1, 128>}, {transform_indices = @transform_7, window_bounds = array<i64: 512, 8>}]} {
    %c0 = arith.constant 0 : index
    %c0_0 = arith.constant 0 : index
    %0 = vector.load %arg1[%c0, %c0_0] : memref<512x128xbf16, #tpu.memory_space<vmem>>, vector<512x128xbf16>
    %1 = arith.extf %0 : vector<512x128xbf16> to vector<512x128xf32>
    %c0_1 = arith.constant 0 : index
    %c0_2 = arith.constant 0 : index
    %2 = vector.load %arg2[%c0_1, %c0_2] : memref<512x128xbf16, #tpu.memory_space<vmem>>, vector<512x128xbf16>
    %3 = arith.extf %2 : vector<512x128xbf16> to vector<512x128xf32>
    %4 = arith.addf %1, %3 : vector<512x128xf32>
    %c0_3 = arith.constant 0 : index
    %c0_4 = arith.constant 0 : index
    %5 = vector.load %arg3[%c0_3, %c0_4] : memref<1x128xf32, #tpu.memory_space<vmem>>, vector<1x128xf32>
    %6 = vector.broadcast %5 : vector<1x128xf32> to vector<512x128xf32>
    %7 = arith.addf %4, %6 : vector<512x128xf32>
    %cst = arith.constant 0.000000e+00 : f32
    %8 = vector.broadcast %cst : f32 to vector<512x128xf32>
    %9 = arith.maximumf %7, %8 : vector<512x128xf32>
    %c0_5 = arith.constant 0 : index
    %c0_6 = arith.constant 0 : index
    %c0_7 = arith.constant 0 : index
    %10 = vector.load %arg4[%c0_5, %c0_6, %c0_7] : memref<2x128x128xbf16, #tpu.memory_space<vmem>>, vector<1x128x128xbf16>
    %11 = vector.shape_cast %10 : vector<1x128x128xbf16> to vector<128x128xbf16>
    %c0_8 = arith.constant 0 : index
    %c0_9 = arith.constant 0 : index
    %c0_10 = arith.constant 0 : index
    %12 = vector.load %arg5[%c0_8, %c0_9, %c0_10] : memref<2x1x128xf32, #tpu.memory_space<vmem>>, vector<1x1x128xf32>
    %13 = vector.shape_cast %12 : vector<1x1x128xf32> to vector<1x128xf32>
    %14 = arith.truncf %9 : vector<512x128xf32> to vector<512x128xbf16>
    %cst_11 = arith.constant dense<0.000000e+00> : vector<512x128xf32>
    %15 = tpu.matmul %14, %11, %cst_11 {dimension_numbers = #tpu.dot_dimension_numbers<[1], [0], [0], [1], [0, 0, 1, 1], [], []>} : vector<512x128xbf16>, vector<128x128xbf16>, vector<512x128xf32> -> vector<512x128xf32>
    %16 = vector.broadcast %13 : vector<1x128xf32> to vector<512x128xf32>
    %17 = arith.addf %15, %16 : vector<512x128xf32>
    %cst_12 = arith.constant 0.000000e+00 : f32
    %18 = vector.broadcast %cst_12 : f32 to vector<512x128xf32>
    %19 = arith.maximumf %17, %18 : vector<512x128xf32>
    %c1 = arith.constant 1 : index
    %c0_13 = arith.constant 0 : index
    %c0_14 = arith.constant 0 : index
    %20 = vector.load %arg4[%c1, %c0_13, %c0_14] : memref<2x128x128xbf16, #tpu.memory_space<vmem>>, vector<1x128x128xbf16>
    %21 = vector.shape_cast %20 : vector<1x128x128xbf16> to vector<128x128xbf16>
    %c1_15 = arith.constant 1 : index
    %c0_16 = arith.constant 0 : index
    %c0_17 = arith.constant 0 : index
    %22 = vector.load %arg5[%c1_15, %c0_16, %c0_17] : memref<2x1x128xf32, #tpu.memory_space<vmem>>, vector<1x1x128xf32>
    %23 = vector.shape_cast %22 : vector<1x1x128xf32> to vector<1x128xf32>
    %24 = arith.truncf %19 : vector<512x128xf32> to vector<512x128xbf16>
    %cst_18 = arith.constant dense<0.000000e+00> : vector<512x128xf32>
    %25 = tpu.matmul %24, %21, %cst_18 {dimension_numbers = #tpu.dot_dimension_numbers<[1], [0], [0], [1], [0, 0, 1, 1], [], []>} : vector<512x128xbf16>, vector<128x128xbf16>, vector<512x128xf32> -> vector<512x128xf32>
    %26 = vector.broadcast %23 : vector<1x128xf32> to vector<512x128xf32>
    %27 = arith.addf %25, %26 : vector<512x128xf32>
    %cst_19 = arith.constant 0.000000e+00 : f32
    %28 = vector.broadcast %cst_19 : f32 to vector<512x128xf32>
    %29 = arith.maximumf %27, %28 : vector<512x128xf32>
    %30 = arith.truncf %29 : vector<512x128xf32> to vector<512x128xbf16>
    %c0_20 = arith.constant 0 : index
    %c0_21 = arith.constant 0 : index
    %31 = vector.load %arg6[%c0_20, %c0_21] : memref<128x128xbf16, #tpu.memory_space<vmem>>, vector<128x128xbf16>
    %cst_22 = arith.constant dense<0.000000e+00> : vector<512x128xf32>
    %32 = tpu.matmul %30, %31, %cst_22 {dimension_numbers = #tpu.dot_dimension_numbers<[1], [0], [0], [1], [0, 0, 1, 1], [], []>} : vector<512x128xbf16>, vector<128x128xbf16>, vector<512x128xf32> -> vector<512x128xf32>
    %c0_23 = arith.constant 0 : index
    %c0_24 = arith.constant 0 : index
    %33 = vector.load %arg7[%c0_23, %c0_24] : memref<1x128xf32, #tpu.memory_space<vmem>>, vector<1x128xf32>
    %34 = vector.broadcast %33 : vector<1x128xf32> to vector<512x128xf32>
    %35 = arith.addf %32, %34 : vector<512x128xf32>
    %cst_25 = arith.constant 0.000000e+00 : f32
    %36 = vector.broadcast %cst_25 : f32 to vector<512x128xf32>
    %37 = arith.maximumf %35, %36 : vector<512x128xf32>
    %38 = vector.extract_strided_slice %37 {offsets = [0, 0], sizes = [512, 8], strides = [1, 1]} : vector<512x128xf32> to vector<512x8xf32>
    %c0_26 = arith.constant 0 : index
    %c0_27 = arith.constant 0 : index
    %39 = vector.load %arg8[%c0_26, %c0_27] : memref<512x8xf32, #tpu.memory_space<vmem>>, vector<512x8xf32>
    tpu.vector_store %arg8[%c0_26, %c0_27], %38 {strides = array<i32>} : memref<512x8xf32, #tpu.memory_space<vmem>>, vector<512x8xf32>,
    return
  }
  func.func @transform_0(%arg0: i32) -> (i32, i32) {
    %c0_i32 = arith.constant 0 : i32
    %c0_i32_0 = arith.constant 0 : i32
    return %arg0, %c0_i32 : i32, i32
  }
  func.func @transform_1(%arg0: i32) -> (i32, i32) {
    %c0_i32 = arith.constant 0 : i32
    %c0_i32_0 = arith.constant 0 : i32
    return %arg0, %c0_i32 : i32, i32
  }
  func.func @transform_2(%arg0: i32) -> (i32, i32) {
    %c0_i32 = arith.constant 0 : i32
    %c0_i32_0 = arith.constant 0 : i32
    %c0_i32_1 = arith.constant 0 : i32
    return %c0_i32, %c0_i32_0 : i32, i32
  }
  func.func @transform_3(%arg0: i32) -> (i32, i32, i32) {
    %c0_i32 = arith.constant 0 : i32
    %c0_i32_0 = arith.constant 0 : i32
    %c0_i32_1 = arith.constant 0 : i32
    %c0_i32_2 = arith.constant 0 : i32
    return %c0_i32, %c0_i32_0, %c0_i32_1 : i32, i32, i32
  }
  func.func @transform_4(%arg0: i32) -> (i32, i32, i32) {
    %c0_i32 = arith.constant 0 : i32
    %c0_i32_0 = arith.constant 0 : i32
    %c0_i32_1 = arith.constant 0 : i32
    %c0_i32_2 = arith.constant 0 : i32
    return %c0_i32, %c0_i32_0, %c0_i32_1 : i32, i32, i32
  }
  func.func @transform_5(%arg0: i32) -> (i32, i32) {
    %c0_i32 = arith.constant 0 : i32
    %c0_i32_0 = arith.constant 0 : i32
    %c0_i32_1 = arith.constant 0 : i32
    return %c0_i32, %c0_i32_0 : i32, i32
  }
  func.func @transform_6(%arg0: i32) -> (i32, i32) {
    %c0_i32 = arith.constant 0 : i32
    %c0_i32_0 = arith.constant 0 : i32
    %c0_i32_1 = arith.constant 0 : i32
    return %c0_i32, %c0_i32_0 : i32, i32
  }
  func.func @transform_7(%arg0: i32) -> (i32, i32) {
    %c0_i32 = arith.constant 0 : i32
    %c0_i32_0 = arith.constant 0 : i32
    return %arg0, %c0_i32 : i32, i32
  }
}

</mosaic_0001>

<bundles_post_ra>
// kernel: batter_pitcher_forward.1
= control target key start
LH: loop header
LB: loop body
LE: loop exit
PB: predicated region body
PF: predicated region fallthrough
CT: control target
= control target key end

     0   :  { %s3095_s24 = smov 0   ;;  %s3738_s0 = inlined_call_operand.vmem [shape: bf16[1024,128], index: 0, kind: input, shape index: {}]   ;;  %s3739_s1 = inlined_call_operand.vmem [shape: bf16[1024,128], index: 1, kind: input, shape index: {}]   ;;  %s3740_s2 = inlined_call_operand.vmem [shape: f32[1,128], index: 2, kind: input, shape index: {}]   ;;  %s3741_s3 = inlined_call_operand.vmem [shape: bf16[2,128,128], index: 3, kind: input, shape index: {}]   ;;  %s3742_s4 = inlined_call_operand.vmem [shape: f32[2,1,128], index: 4, kind: input, shape index: {}]   ;;  %s3743_s5 = inlined_call_operand.vmem [shape: bf16[128,128], index: 5, kind: input, shape index: {}]   ;;  %s3744_s6 = inlined_call_operand.vmem [shape: f32[1,128], index: 6, kind: input, shape index: {}]   ;;  %s3745_s7 = inlined_call_operand.vmem [shape: f32[1024,8], index: 7, kind: output, shape index: {}]  }
   0x1 LB: > { %s2263_s25 = sadd.s32 4294967295, %s3053_s24   ;;  %p2267_p0 = scmp.ge.s32.totalorder %s3053_s24, 1  ;;  %s3053_s24 = sphi %s3095_s24, %s17_s24  }
   0x2   : > { %p249_p1 = scmp.lt.s32.totalorder %s3053_s24, 3 }
   0x4   : > { %p250_p2 = pnand %p2267_p0, %p249_p1 }
   0x5   : > { %v3023_v0 = vld [vmem:[%s3741_s3] sm:$0xff] (!%p250_p2)   ;;  %s2268_s28 = sshll.u32 (!%p250_p2), %s2263_s25, 6  ;;  %v3024_v1 = vld [vmem:[%s3741_s3 + $0x8] sm:$0xff] (!%p250_p2)   ;;  %v3025_v2 = vld [vmem:[%s3741_s3 + $0x10] sm:$0xff] (!%p250_p2)   ;;  %vm2130_vm0 = vcmask (!%p250_p2), 64512  }
   0x6   : > { %253 = sbr.rel (%p250_p2) target bundleno = 822 (0x336), region = 48  ;;  %p287_p3 = scmp.lt.s32.totalorder (!%p250_p2), %s2268_s28, 127  ;;  %2759 = vmatprep.subr.bf16.mxu0 (!%p250_p2), %v3023_v0  ;;  %2999 = vmatprep.subr.bf16.mxu1 (!%p250_p2), %v3023_v0  ;;  %v3026_v3 = vld [vmem:[%s3741_s3 + $0x18] sm:$0xff] (!%p250_p2)   ;;  %v3136_v13 = vld [vmem:[%s3740_s2] ss:$0 sm:$0xff] (!%p250_p2)  ;;  %v3028_v43 = vld [vmem:[%s3741_s3 + $0x28] sm:$0xff] (!%p250_p2)  }
   0x7   : > { %2760 = vmatpush3.bf16.msra.mxu0 (!%p250_p2), %v3023_v0  ;;  %3007 = vmatpush3.bf16.msra.mxu1 (!%p250_p2), %v3023_v0  ;;  %v3027_v24 = vld [vmem:[%s3741_s3 + $0x20] sm:$0xff] (!%p250_p2)   ;;  %v3029_v0 = vld [vmem:[%s3741_s3 + $0x30] sm:$0xff] (!%p250_p2)  }
   0x8   : > { %2761 = vmatprep.subr.bf16.mxu0 (!%p250_p2), %v3024_v1  ;;  %3000 = vmatprep.subr.bf16.mxu1 (!%p250_p2), %v3024_v1 }
   0xb   : > { %2762 = vmatpush3.bf16.msra.mxu0 (!%p250_p2), %v3024_v1  ;;  %3008 = vmatpush3.bf16.msra.mxu1 (!%p250_p2), %v3024_v1 }
   0xc   : > { %2763 = vmatprep.subr.bf16.mxu0 (!%p250_p2), %v3025_v2  ;;  %3001 = vmatprep.subr.bf16.mxu1 (!%p250_p2), %v3025_v2 }
   0xd   : > { %s3747_s28 = smov (!%p287_p3, %s2268_s28), 127 }
   0xe   : > { %s2269_s10 = sshll.u32 %s3747_s28, 2  ;;  %s2273_s26 = sshll.u32 %s3747_s28, 3 }
   0xf   : > { %s3118_s13 = scalar_lea.vmem %s3738_s0, %s2269_s10  ;;  %s3123_s16 = scalar_lea.vmem %s3739_s1, %s2269_s10  ;;  %2764 = vmatpush3.bf16.msra.mxu0 %v3025_v2  ;;  %3009 = vmatpush3.bf16.msra.mxu1 %v3025_v2 }
  0x10   : > { %v2322_v4 = vld [vmem:[%s3118_s13] sm:$0xff]   ;;  %v2577_v10 = vld [vmem:[%s3118_s13 + $0x8] sm:$0xff]   ;;  %v2578_v12 = vld [vmem:[%s3118_s13 + $0x10] sm:$0xff]   ;;  %2765 = vmatprep.subr.bf16.mxu0 %v3026_v3  ;;  %3002 = vmatprep.subr.bf16.mxu1 %v3026_v3  ;;  %s3542_s30 = scalar_lea.vmem %s3745_s7, %s2273_s26 }
  0x11   : > { %v2450_v5 = vld [vmem:[%s3123_s16] sm:$0xff]   ;;  %v2323_v6 = vunpack.c.l.bf16 %v2322_v4  ;;  %v2324_v7 = vunpack.c.h.bf16 %v2322_v4  ;;  %v2608_v11 = vld [vmem:[%s3123_s16 + $0x8] sm:$0xff]   ;;  %v2327_v14 = vunpack.c.l.bf16 %v2577_v10  ;;  %v2328_v15 = vunpack.c.h.bf16 %v2577_v10  ;;  %v2609_v18 = vld [vmem:[%s3123_s16 + $0x10] sm:$0xff]  }
  0x12   : > { %v2451_v8 = vunpack.c.l.bf16 %v2450_v5  ;;  %v2452_v9 = vunpack.c.h.bf16 %v2450_v5  ;;  %v2455_v16 = vunpack.c.l.bf16 %v2608_v11  ;;  %v2456_v17 = vunpack.c.h.bf16 %v2608_v11  ;;  %v2579_v19 = vld [vmem:[%s3118_s13 + $0x18] sm:$0xff]   ;;  %v2580_v38 = vld [vmem:[%s3118_s13 + $0x20] sm:$0xff]   ;;  %v2581_v53 = vld [vmem:[%s3118_s13 + $0x28] sm:$0xff]  }
  0x13   : > { %v2331_v22 = vunpack.c.l.bf16 %v2578_v12  ;;  %v2332_v23 = vunpack.c.h.bf16 %v2578_v12  ;;  %v2459_v27 = vunpack.c.l.bf16 %v2609_v18  ;;  %v2460_v28 = vunpack.c.h.bf16 %v2609_v18  ;;  %v2610_v29 = vld [vmem:[%s3123_s16 + $0x18] sm:$0xff]   ;;  %2766 = vmatpush3.bf16.msra.mxu0 %v3026_v3  ;;  %3010 = vmatpush3.bf16.msra.mxu1 %v3026_v3  ;;  %v2611_v48 = vld [vmem:[%s3123_s16 + $0x20] sm:$0xff]   ;;  %v2612_v54 = vld [vmem:[%s3123_s16 + $0x28] sm:$0xff]  }
  0x14   : > { %v561_v20 = vadd.f32 %v2451_v8, %v2323_v6  ;;  %v562_v21 = vadd.f32 %v2452_v9, %v2324_v7  ;;  %v563_v25 = vadd.f32 %v2455_v16, %v2327_v14  ;;  %v564_v26 = vadd.f32 %v2456_v17, %v2328_v15  ;;  %2767 = vmatprep.subr.bf16.mxu0 %v3027_v24  ;;  %v2582_v63 = vld [vmem:[%s3118_s13 + $0x30] sm:$0xff]   ;;  %v2583_v10 = vld [vmem:[%s3118_s13 + $0x38] sm:$0xff]  }
  0x15   : > { %v2335_v32 = vunpack.c.l.bf16 %v2579_v19  ;;  %v2336_v33 = vunpack.c.h.bf16 %v2579_v19  ;;  %v565_v36 = vadd.f32 %v2459_v27, %v2331_v22  ;;  %v566_v37 = vadd.f32 %v2460_v28, %v2332_v23  ;;  %3003 = vmatprep.subr.bf16.mxu1 %v3027_v24  ;;  %v2613_v5 = vld [vmem:[%s3123_s16 + $0x30] sm:$0xff]  }
  0x16   : > { %v632_v30 = vadd.f32 %v3136_v13, %v561_v20  ;;  %v633_v31 = vadd.f32 %v3136_v13, %v562_v21  ;;  %v634_v34 = vadd.f32 %v3136_v13, %v563_v25  ;;  %v635_v35 = vadd.f32 %v3136_v13, %v564_v26  ;;  %v2614_v20 = vld [vmem:[%s3123_s16 + $0x38] sm:$0xff]   ;;  %v2584_v26 = vld [vmem:[%s3118_s13 + $0x40] sm:$0xff]  }
  0x17   : > { %v2463_v41 = vunpack.c.l.bf16 %v2610_v29  ;;  %v2464_v42 = vunpack.c.h.bf16 %v2610_v29  ;;  %v636_v46 = vadd.f32 %v3136_v13, %v565_v36  ;;  %v637_v47 = vadd.f32 %v3136_v13, %v566_v37  ;;  %2768 = vmatpush3.bf16.msra.mxu0 %v3027_v24  ;;  %3011 = vmatpush3.bf16.msra.mxu1 %v3027_v24  ;;  %v3030_v21 = vld [vmem:[%s3741_s3 + $0x38] sm:$0xff]  }
  0x18   : > { %v696_v39 = vmax.f32 %v632_v30, 0.0  ;;  %v697_v40 = vmax.f32 %v633_v31, 0.0  ;;  %v698_v44 = vmax.f32 %v634_v34, 0.0  ;;  %v699_v45 = vmax.f32 %v635_v35, 0.0  ;;  %2769 = vmatprep.subr.bf16.mxu0 %v3028_v43  ;;  %3004 = vmatprep.subr.bf16.mxu1 %v3028_v43  ;;  %v2615_v35 = vld [vmem:[%s3123_s16 + $0x40] sm:$0xff]  }
  0x19   : > { %v567_v50 = vadd.f32 %v2463_v41, %v2335_v32  ;;  %v568_v51 = vadd.f32 %v2464_v42, %v2336_v33  ;;  %v2339_v52 = vunpack.c.l.bf16 %v2580_v38  ;;  %v700_v56 = vmax.f32 %v636_v46, 0.0 }
  0x1a   : > { %v777_v49 = vpack.c.bf16 %v697_v40, %v696_v39  ;;  %v3157_v55 = vpack.c.bf16 %v699_v45, %v698_v44  ;;  %v701_v57 = vmax.f32 %v637_v47, 0.0  ;;  %v2340_v58 = vunpack.c.h.bf16 %v2580_v38  ;;  %v2585_v40 = vld [vmem:[%s3118_s13 + $0x48] sm:$0xff]  }
  0x1b   : > { %v638_v59 = vadd.f32 %v3136_v13, %v567_v50  ;;  %v639_v60 = vadd.f32 %v3136_v13, %v568_v51  ;;  %v2467_v61 = vunpack.c.l.bf16 %v2611_v48  ;;  %v2468_v62 = vunpack.c.h.bf16 %v2611_v48  ;;  %2770 = vmatpush3.bf16.msra.mxu0 %v3028_v43  ;;  %3012 = vmatpush3.bf16.msra.mxu1 %v3028_v43  ;;  %v2586_v50 = vld [vmem:[%s3118_s13 + $0x50] sm:$0xff]  }
  0x1c   : > { %2775 = vmatprep.mubr.bf16.mxu0 %v777_v49  ;;  %v3165_v1 = vpack.c.bf16 %v701_v57, %v700_v56  ;;  %v2343_v2 = vunpack.c.l.bf16 %v2581_v53  ;;  %v2344_v3 = vunpack.c.h.bf16 %v2581_v53  ;;  %v2471_v4 = vunpack.c.l.bf16 %v2612_v54  ;;  %2771 = vmatprep.subr.bf16.mxu0 %v3029_v0  ;;  %v2616_v49 = vld [vmem:[%s3123_s16 + $0x48] sm:$0xff]   ;;  %v3194_v56 = vld [vmem:[%s3741_s3 + $0x40] sm:$0xff]  }
  0x1d   : > { %v702_v6 = vmax.f32 %v638_v59, 0.0  ;;  %v703_v7 = vmax.f32 %v639_v60, 0.0  ;;  %v569_v8 = vadd.f32 %v2467_v61, %v2339_v52  ;;  %v570_v9 = vadd.f32 %v2468_v62, %v2340_v58  ;;  %3005 = vmatprep.subr.bf16.mxu1 %v3029_v0  ;;  %v2617_v61 = vld [vmem:[%s3123_s16 + $0x50] sm:$0xff]  }
  0x1e   : > { %v2472_v11 = vunpack.c.h.bf16 %v2612_v54  ;;  %v571_v12 = vadd.f32 %v2471_v4, %v2343_v2  ;;  %v2347_v14 = vunpack.c.l.bf16 %v2582_v63  ;;  %v2348_v15 = vunpack.c.h.bf16 %v2582_v63 }
  0x1f   : > { %v3169_v16 = vpack.c.bf16 %v703_v7, %v702_v6  ;;  %v640_v17 = vadd.f32 %v3136_v13, %v569_v8  ;;  %v641_v18 = vadd.f32 %v3136_v13, %v570_v9  ;;  %v2475_v19 = vunpack.c.l.bf16 %v2613_v5  ;;  %2772 = vmatpush3.bf16.msra.mxu0 %v3029_v0  ;;  %3013 = vmatpush3.bf16.msra.mxu1 %v3029_v0  ;;  %v2587_v7 = vld [vmem:[%s3118_s13 + $0x58] sm:$0xff]  }
  0x20   : > { %v572_v22 = vadd.f32 %v2472_v11, %v2344_v3  ;;  %v642_v23 = vadd.f32 %v3136_v13, %v571_v12  ;;  %v2476_v24 = vunpack.c.h.bf16 %v2613_v5  ;;  %v2351_v25 = vunpack.c.l.bf16 %v2583_v10  ;;  %2773 = vmatprep.subr.bf16.mxu0 %v3030_v21  ;;  %3006 = vmatprep.subr.bf16.mxu1 %v3030_v21  ;;  %v2618_v12 = vld [vmem:[%s3123_s16 + $0x58] sm:$0xff]  }
  0x21   : > { %v704_v27 = vmax.f32 %v640_v17, 0.0  ;;  %v705_v28 = vmax.f32 %v641_v18, 0.0  ;;  %v573_v29 = vadd.f32 %v2475_v19, %v2347_v14  ;;  %v2352_v30 = vunpack.c.h.bf16 %v2583_v10  ;;  %v2588_v19 = vld [vmem:[%s3118_s13 + $0x60] sm:$0xff]  }
  0x22   : > { %v643_v31 = vadd.f32 %v3136_v13, %v572_v22  ;;  %v706_v32 = vmax.f32 %v642_v23, 0.0  ;;  %v574_v33 = vadd.f32 %v2476_v24, %v2348_v15  ;;  %v2479_v34 = vunpack.c.l.bf16 %v2614_v20  ;;  %v2589_v24 = vld [vmem:[%s3118_s13 + $0x68] sm:$0xff]  }
  0x23   : > { %v3181_v36 = vpack.c.bf16 %v705_v28, %v704_v27  ;;  %v644_v37 = vadd.f32 %v3136_v13, %v573_v29  ;;  %v2480_v38 = vunpack.c.h.bf16 %v2614_v20  ;;  %v2355_v39 = vunpack.c.l.bf16 %v2584_v26  ;;  %2774 = vmatpush3.bf16.msra.mxu0 %v3030_v21  ;;  %3014 = vmatpush3.bf16.msra.mxu1 %v3030_v21  ;;  %v2619_v20 = vld [vmem:[%s3123_s16 + $0x60] sm:$0xff]   ;;  %v2620_v28 = vld [vmem:[%s3123_s16 + $0x68] sm:$0xff]  }
  0x24   : > { %v707_v41 = vmax.f32 %v643_v31, 0.0  ;;  %v645_v42 = vadd.f32 %v3136_v13, %v574_v33  ;;  %v575_v43 = vadd.f32 %v2479_v34, %v2351_v25  ;;  %v2356_v44 = vunpack.c.h.bf16 %v2584_v26  ;;  %2839 = vmatprep.subr.bf16.mxu1 %v3194_v56 }
  0x25   : > { %v708_v45 = vmax.f32 %v644_v37, 0.0  ;;  %v576_v46 = vadd.f32 %v2480_v38, %v2352_v30  ;;  %v2483_v47 = vunpack.c.l.bf16 %v2615_v35  ;;  %v2484_v48 = vunpack.c.h.bf16 %v2615_v35 }
  0x26   : > { %v3188_v51 = vpack.c.bf16 %v707_v41, %v706_v32  ;;  %v709_v52 = vmax.f32 %v645_v42, 0.0  ;;  %v646_v53 = vadd.f32 %v3136_v13, %v575_v43  ;;  %v2359_v54 = vunpack.c.l.bf16 %v2585_v40  ;;  %2776 = vmatmul.mubr.bf16.vlgmr.msra.gmra.mrb[0].mxu0 %v3157_v55  ;;  %v2590_v42 = vld [vmem:[%s3118_s13 + $0x70] sm:$0xff]  }
  0x27   : > { %v647_v57 = vadd.f32 %v3136_v13, %v576_v46  ;;  %v577_v58 = vadd.f32 %v2483_v47, %v2355_v39  ;;  %v578_v59 = vadd.f32 %v2484_v48, %v2356_v44  ;;  %v2360_v60 = vunpack.c.h.bf16 %v2585_v40  ;;  %2779 = vmatprep.mubr.bf16.mxu0 %v3165_v1  ;;  %v2621_v47 = vld [vmem:[%s3123_s16 + $0x70] sm:$0xff]  }
  0x28   : > { %v3198_v62 = vpack.c.bf16 %v709_v52, %v708_v45  ;;  %v710_v63 = vmax.f32 %v646_v53, 0.0  ;;  %v2487_v0 = vunpack.c.l.bf16 %v2616_v49  ;;  %v2488_v2 = vunpack.c.h.bf16 %v2616_v49 }
  0x29   : > { %v711_v3 = vmax.f32 %v647_v57, 0.0  ;;  %v648_v4 = vadd.f32 %v3136_v13, %v577_v58  ;;  %v649_v5 = vadd.f32 %v3136_v13, %v578_v59  ;;  %v2363_v6 = vunpack.c.l.bf16 %v2586_v50 }
  0x2a   : > { %v579_v8 = vadd.f32 %v2487_v0, %v2359_v54  ;;  %v580_v9 = vadd.f32 %v2488_v2, %v2360_v60  ;;  %v2364_v10 = vunpack.c.h.bf16 %v2586_v50  ;;  %v2491_v11 = vunpack.c.l.bf16 %v2617_v61 }
  0x2b   : > { %v3207_v14 = vpack.c.bf16 %v711_v3, %v710_v63  ;;  %v712_v15 = vmax.f32 %v648_v4, 0.0  ;;  %v713_v17 = vmax.f32 %v649_v5, 0.0  ;;  %v2492_v18 = vunpack.c.h.bf16 %v2617_v61  ;;  %v2622_v5 = vld [vmem:[%s3123_s16 + $0x78] sm:$0xff]  }
  0x2c   : > { %v650_v21 = vadd.f32 %v3136_v13, %v579_v8  ;;  %v651_v55 = vadd.f32 %v3136_v13, %v580_v9  ;;  %v581_v22 = vadd.f32 %v2491_v11, %v2363_v6  ;;  %v2367_v23 = vunpack.c.l.bf16 %v2587_v7 }
  0x2d   : > { %v3214_v25 = vpack.c.bf16 %v713_v17, %v712_v15  ;;  %v582_v26 = vadd.f32 %v2492_v18, %v2364_v10  ;;  %v2368_v1 = vunpack.c.h.bf16 %v2587_v7  ;;  %v2495_v27 = vunpack.c.l.bf16 %v2618_v12  ;;  %v2592_v15 = vld [vmem:[%s3118_s13 + $0x80] sm:$0xff]  }
  0x2e   : > { %v714_v29 = vmax.f32 %v650_v21, 0.0  ;;  %v715_v30 = vmax.f32 %v651_v55, 0.0  ;;  %v652_v31 = vadd.f32 %v3136_v13, %v581_v22  ;;  %v2496_v32 = vunpack.c.h.bf16 %v2618_v12  ;;  %2780 = vmatmul.mubr.bf16.gmra.mrb[4].mxu0 %v3169_v16  ;;  %v2591_v16 = vld [vmem:[%s3118_s13 + $0x78] sm:$0xff]   ;;  %v2623_v21 = vld [vmem:[%s3123_s16 + $0x80] sm:$0xff]  }
  0x2f   : > { %v653_v33 = vadd.f32 %v3136_v13, %v582_v26  ;;  %v583_v34 = vadd.f32 %v2495_v27, %v2367_v23  ;;  %v2371_v35 = vunpack.c.l.bf16 %v2588_v19  ;;  %v2372_v37 = vunpack.c.h.bf16 %v2588_v19  ;;  %2783 = vmatprep.mubr.bf16.mxu0 %v3181_v36  ;;  %v2593_v26 = vld [vmem:[%s3118_s13 + $0x88] sm:$0xff]  }
  0x30   : > { %v3219_v38 = vpack.c.bf16 %v715_v30, %v714_v29  ;;  %v716_v39 = vmax.f32 %v652_v31, 0.0  ;;  %v584_v40 = vadd.f32 %v2496_v32, %v2368_v1  ;;  %v2499_v41 = vunpack.c.l.bf16 %v2619_v20  ;;  %v2624_v30 = vld [vmem:[%s3123_s16 + $0x88] sm:$0xff]  }
  0x31   : > { %v717_v43 = vmax.f32 %v653_v33, 0.0  ;;  %v654_v44 = vadd.f32 %v3136_v13, %v583_v34  ;;  %v2500_v45 = vunpack.c.h.bf16 %v2619_v20  ;;  %v2375_v46 = vunpack.c.l.bf16 %v2589_v24 }
  0x32   : > { %v655_v48 = vadd.f32 %v3136_v13, %v584_v40  ;;  %v585_v49 = vadd.f32 %v2499_v41, %v2371_v35  ;;  %v2376_v50 = vunpack.c.h.bf16 %v2589_v24  ;;  %v2503_v52 = vunpack.c.l.bf16 %v2620_v28  ;;  %v2594_v40 = vld [vmem:[%s3118_s13 + $0x90] sm:$0xff]  }
  0x33   : > { %v3227_v53 = vpack.c.bf16 %v717_v43, %v716_v39  ;;  %v718_v54 = vmax.f32 %v654_v44, 0.0  ;;  %v586_v57 = vadd.f32 %v2500_v45, %v2372_v37  ;;  %v2504_v58 = vunpack.c.h.bf16 %v2620_v28  ;;  %v2625_v45 = vld [vmem:[%s3123_s16 + $0x90] sm:$0xff]  }
  0x34   : > { %v719_v59 = vmax.f32 %v655_v48, 0.0  ;;  %v656_v60 = vadd.f32 %v3136_v13, %v585_v49  ;;  %v587_v61 = vadd.f32 %v2503_v52, %v2375_v46  ;;  %v2379_v63 = vunpack.c.l.bf16 %v2590_v42 }
  0x35   : > { %v657_v0 = vadd.f32 %v3136_v13, %v586_v57  ;;  %v588_v2 = vadd.f32 %v2504_v58, %v2376_v50  ;;  %v2380_v3 = vunpack.c.h.bf16 %v2590_v42  ;;  %v2507_v4 = vunpack.c.l.bf16 %v2621_v47  ;;  %v2595_v57 = vld [vmem:[%s3118_s13 + $0x98] sm:$0xff]  }
  0x36   : > { %v3233_v36 = vpack.c.bf16 %v719_v59, %v718_v54  ;;  %v720_v6 = vmax.f32 %v656_v60, 0.0  ;;  %v658_v7 = vadd.f32 %v3136_v13, %v587_v61  ;;  %v2508_v8 = vunpack.c.h.bf16 %v2621_v47  ;;  %2784 = vmatmul.mubr.bf16.gmra.mrb[8].mxu0 %v3188_v51 }
  0x37   : > { %v721_v9 = vmax.f32 %v657_v0, 0.0  ;;  %v659_v10 = vadd.f32 %v3136_v13, %v588_v2  ;;  %v589_v11 = vadd.f32 %v2507_v4, %v2379_v63  ;;  %v2383_v12 = vunpack.c.l.bf16 %v2591_v16  ;;  %2787 = vmatprep.mubr.bf16.mxu0 %v3198_v62  ;;  %v2626_v63 = vld [vmem:[%s3123_s16 + $0x98] sm:$0xff]  }
  0x38   : > { %v722_v17 = vmax.f32 %v658_v7, 0.0  ;;  %v590_v18 = vadd.f32 %v2508_v8, %v2380_v3  ;;  %v2384_v19 = vunpack.c.h.bf16 %v2591_v16  ;;  %v2511_v20 = vunpack.c.l.bf16 %v2622_v5  ;;  %v2596_v8 = vld [vmem:[%s3118_s13 + $0xa0] sm:$0xff]  }
  0x39   : > { %v3239_v55 = vpack.c.bf16 %v721_v9, %v720_v6  ;;  %v723_v22 = vmax.f32 %v659_v10, 0.0  ;;  %v660_v23 = vadd.f32 %v3136_v13, %v589_v11  ;;  %v2512_v24 = vunpack.c.h.bf16 %v2622_v5 }
  0x3a   : > { %v661_v1 = vadd.f32 %v3136_v13, %v590_v18  ;;  %v591_v27 = vadd.f32 %v2511_v20, %v2383_v12  ;;  %v2387_v28 = vunpack.c.l.bf16 %v2592_v15  ;;  %v2388_v29 = vunpack.c.h.bf16 %v2592_v15  ;;  %v2627_v15 = vld [vmem:[%s3123_s16 + $0xa0] sm:$0xff]   ;;  %v2597_v20 = vld [vmem:[%s3118_s13 + $0xa8] sm:$0xff]  }
  0x3b   : > { %v3247_v31 = vpack.c.bf16 %v723_v22, %v722_v17  ;;  %v724_v32 = vmax.f32 %v660_v23, 0.0  ;;  %v592_v33 = vadd.f32 %v2512_v24, %v2384_v19  ;;  %v2515_v34 = vunpack.c.l.bf16 %v2623_v21 }
  0x3c   : > { %v725_v35 = vmax.f32 %v661_v1, 0.0  ;;  %v662_v37 = vadd.f32 %v3136_v13, %v591_v27  ;;  %v2516_v39 = vunpack.c.h.bf16 %v2623_v21  ;;  %v2391_v51 = vunpack.c.l.bf16 %v2593_v26 }
  0x3d   : > { %v663_v41 = vadd.f32 %v3136_v13, %v592_v33  ;;  %v593_v42 = vadd.f32 %v2515_v34, %v2387_v28  ;;  %v2392_v43 = vunpack.c.h.bf16 %v2593_v26  ;;  %v2519_v44 = vunpack.c.l.bf16 %v2624_v30  ;;  %v2628_v26 = vld [vmem:[%s3123_s16 + $0xa8] sm:$0xff]  }
  0x3e   : > { %v3253_v62 = vpack.c.bf16 %v725_v35, %v724_v32  ;;  %v726_v46 = vmax.f32 %v662_v37, 0.0  ;;  %v594_v47 = vadd.f32 %v2516_v39, %v2388_v29  ;;  %v2520_v48 = vunpack.c.h.bf16 %v2624_v30  ;;  %2788 = vmatmul.mubr.bf16.gmra.mrb[12].mxu0 %v3207_v14  ;;  %v3032_v29 = vld [vmem:[%s3741_s3 + $0x48] sm:$0xff]   ;;  %v2598_v35 = vld [vmem:[%s3118_s13 + $0xb0] sm:$0xff]  }
  0x3f   : > { %v727_v49 = vmax.f32 %v663_v41, 0.0  ;;  %v664_v50 = vadd.f32 %v3136_v13, %v593_v42  ;;  %v595_v52 = vadd.f32 %v2519_v44, %v2391_v51  ;;  %v2395_v54 = vunpack.c.l.bf16 %v2594_v40  ;;  %2791 = vmatprep.mubr.bf16.mxu0 %v3214_v25  ;;  %v2629_v41 = vld [vmem:[%s3123_s16 + $0xb0] sm:$0xff]  }
  0x40   : > { %v665_v58 = vadd.f32 %v3136_v13, %v594_v47  ;;  %v596_v59 = vadd.f32 %v2520_v48, %v2392_v43  ;;  %v2396_v60 = vunpack.c.h.bf16 %v2594_v40  ;;  %v2523_v61 = vunpack.c.l.bf16 %v2625_v45 }
  0x41   : > { %v3259_v16 = vpack.c.bf16 %v727_v49, %v726_v46  ;;  %v728_v0 = vmax.f32 %v664_v50, 0.0  ;;  %v666_v2 = vadd.f32 %v3136_v13, %v595_v52  ;;  %v2524_v3 = vunpack.c.h.bf16 %v2625_v45  ;;  %v2599_v50 = vld [vmem:[%s3118_s13 + $0xb8] sm:$0xff]   ;;  %v3033_v52 = vld [vmem:[%s3741_s3 + $0x50] sm:$0xff]  }
  0x42   : > { %v729_v4 = vmax.f32 %v665_v58, 0.0  ;;  %v667_v5 = vadd.f32 %v3136_v13, %v596_v59  ;;  %v597_v6 = vadd.f32 %v2523_v61, %v2395_v54  ;;  %v2399_v7 = vunpack.c.l.bf16 %v2595_v57  ;;  %v2630_v58 = vld [vmem:[%s3123_s16 + $0xb8] sm:$0xff]  }
  0x43   : > { %v730_v9 = vmax.f32 %v666_v2, 0.0  ;;  %v598_v10 = vadd.f32 %v2524_v3, %v2396_v60  ;;  %v2400_v11 = vunpack.c.h.bf16 %v2595_v57  ;;  %v2527_v12 = vunpack.c.l.bf16 %v2626_v63 }
  0x44   : > { %v793_v17 = vpack.c.bf16 %v729_v4, %v728_v0  ;;  %v731_v18 = vmax.f32 %v667_v5, 0.0  ;;  %v668_v19 = vadd.f32 %v3136_v13, %v597_v6  ;;  %v2528_v14 = vunpack.c.h.bf16 %v2626_v63 }
  0x45   : > { %v669_v21 = vadd.f32 %v3136_v13, %v598_v10  ;;  %v599_v22 = vadd.f32 %v2527_v12, %v2399_v7  ;;  %v2403_v23 = vunpack.c.l.bf16 %v2596_v8  ;;  %v2404_v24 = vunpack.c.h.bf16 %v2596_v8  ;;  %v3034_v10 = vld [vmem:[%s3741_s3 + $0x58] sm:$0xff]  }
  0x46   : > { %2807 = vmatprep.mubr.bf16.mxu1 %v793_v17  ;;  %v794_v25 = vpack.c.bf16 %v731_v18, %v730_v9  ;;  %v732_v1 = vmax.f32 %v668_v19, 0.0  ;;  %v600_v27 = vadd.f32 %v2528_v14, %v2400_v11  ;;  %v2531_v28 = vunpack.c.l.bf16 %v2627_v15  ;;  %2792 = vmatmul.mubr.bf16.gmra.mrb[16].mxu0 %v3219_v38  ;;  %v2631_v9 = vld [vmem:[%s3123_s16 + $0xc0] sm:$0xff]   ;;  %v2601_v18 = vld [vmem:[%s3118_s13 + $0xc8] sm:$0xff]  }
  0x47   : > { %v733_v30 = vmax.f32 %v669_v21, 0.0  ;;  %v670_v32 = vadd.f32 %v3136_v13, %v599_v22  ;;  %v2532_v33 = vunpack.c.h.bf16 %v2627_v15  ;;  %v2407_v34 = vunpack.c.l.bf16 %v2597_v20  ;;  %2795 = vmatprep.mubr.bf16.mxu0 %v3227_v53  ;;  %v2600_v53 = vld [vmem:[%s3118_s13 + $0xc0] sm:$0xff]   ;;  %v2632_v22 = vld [vmem:[%s3123_s16 + $0xc8] sm:$0xff]  }
  0x48   : > { %2808 = vmatmul.mubr.bf16.vlgmr.msra.gmra.mrb[0].mxu1 %v794_v25  ;;  %v671_v37 = vadd.f32 %v3136_v13, %v600_v27  ;;  %v601_v39 = vadd.f32 %v2531_v28, %v2403_v23  ;;  %v2408_v51 = vunpack.c.h.bf16 %v2597_v20  ;;  %v2535_v40 = vunpack.c.l.bf16 %v2628_v26 }
  0x49   : > { %v795_v42 = vpack.c.bf16 %v733_v30, %v732_v1  ;;  %v734_v43 = vmax.f32 %v670_v32, 0.0  ;;  %v602_v44 = vadd.f32 %v2532_v33, %v2404_v24  ;;  %v2536_v45 = vunpack.c.h.bf16 %v2628_v26  ;;  %2840 = vmatpush3.bf16.msra.mxu1 %v3194_v56  ;;  %v2602_v30 = vld [vmem:[%s3118_s13 + $0xd0] sm:$0xff]   ;;  %v3035_v32 = vld [vmem:[%s3741_s3 + $0x60] sm:$0xff]  }
  0x4a   : > { %v735_v46 = vmax.f32 %v671_v37, 0.0  ;;  %v672_v47 = vadd.f32 %v3136_v13, %v601_v39  ;;  %v603_v48 = vadd.f32 %v2535_v40, %v2407_v34  ;;  %v2411_v49 = vunpack.c.l.bf16 %v2598_v35  ;;  %2841 = vmatprep.subr.bf16.mxu1 %v3032_v29 }
  0x4b   : > { %2811 = vmatprep.mubr.bf16.mxu1 %v795_v42  ;;  %v673_v54 = vadd.f32 %v3136_v13, %v602_v44  ;;  %v604_v56 = vadd.f32 %v2536_v45, %v2408_v51  ;;  %v2412_v57 = vunpack.c.h.bf16 %v2598_v35  ;;  %v2539_v38 = vunpack.c.l.bf16 %v2629_v41 }
  0x4c   : > { %v796_v59 = vpack.c.bf16 %v735_v46, %v734_v43  ;;  %v736_v60 = vmax.f32 %v672_v47, 0.0  ;;  %v674_v61 = vadd.f32 %v3136_v13, %v603_v48  ;;  %v2540_v63 = vunpack.c.h.bf16 %v2629_v41  ;;  %v2603_v46 = vld [vmem:[%s3118_s13 + $0xd8] sm:$0xff]  }
  0x4d   : > { %v737_v0 = vmax.f32 %v673_v54, 0.0  ;;  %v675_v2 = vadd.f32 %v3136_v13, %v604_v56  ;;  %v605_v3 = vadd.f32 %v2539_v38, %v2411_v49  ;;  %v2415_v4 = vunpack.c.l.bf16 %v2599_v50  ;;  %2842 = vmatpush3.bf16.msra.mxu1 %v3032_v29 }
  0x4e   : > { %v738_v5 = vmax.f32 %v674_v61, 0.0  ;;  %v606_v6 = vadd.f32 %v2540_v63, %v2412_v57  ;;  %v2416_v7 = vunpack.c.h.bf16 %v2599_v50  ;;  %v2543_v8 = vunpack.c.l.bf16 %v2630_v58  ;;  %2843 = vmatprep.subr.bf16.mxu1 %v3033_v52  ;;  %2796 = vmatmul.mubr.bf16.gmra.mrb[20].mxu0 %v3233_v36  ;;  %v2633_v36 = vld [vmem:[%s3123_s16 + $0xd0] sm:$0xff]   ;;  %v2634_v50 = vld [vmem:[%s3123_s16 + $0xd8] sm:$0xff]   ;;  %v2604_v63 = vld [vmem:[%s3118_s13 + $0xe0] sm:$0xff]  }
  0x4f   : > { %v797_v11 = vpack.c.bf16 %v737_v0, %v736_v60  ;;  %v739_v12 = vmax.f32 %v675_v2, 0.0  ;;  %v676_v15 = vadd.f32 %v3136_v13, %v605_v3  ;;  %v2544_v17 = vunpack.c.h.bf16 %v2630_v58  ;;  %2799 = vmatprep.mubr.bf16.mxu0 %v3239_v55 }
  0x50   : > { %2812 = vmatmul.mubr.bf16.gmra.mrb[4].mxu1 %v796_v59  ;;  %v677_v19 = vadd.f32 %v3136_v13, %v606_v6  ;;  %v607_v14 = vadd.f32 %v2543_v8, %v2415_v4  ;;  %v2419_v20 = vunpack.c.l.bf16 %v2600_v53  ;;  %v2420_v21 = vunpack.c.h.bf16 %v2600_v53  ;;  %v2635_v53 = vld [vmem:[%s3123_s16 + $0xe0] sm:$0xff]  }
  0x51   : > { %2815 = vmatprep.mubr.bf16.mxu1 %v797_v11  ;;  %v798_v23 = vpack.c.bf16 %v739_v12, %v738_v5  ;;  %v740_v24 = vmax.f32 %v676_v15, 0.0  ;;  %v608_v26 = vadd.f32 %v2544_v17, %v2416_v7  ;;  %v2547_v25 = vunpack.c.l.bf16 %v2631_v9  ;;  %2844 = vmatpush3.bf16.msra.mxu1 %v3033_v52  ;;  %v3036_v52 = vld [vmem:[%s3741_s3 + $0x68] sm:$0xff]  }
  0x52   : > { %v741_v1 = vmax.f32 %v677_v19, 0.0  ;;  %v678_v27 = vadd.f32 %v3136_v13, %v607_v14  ;;  %v2548_v28 = vunpack.c.h.bf16 %v2631_v9  ;;  %v2423_v29 = vunpack.c.l.bf16 %v2601_v18  ;;  %2845 = vmatprep.subr.bf16.mxu1 %v3034_v10  ;;  %v2605_v9 = vld [vmem:[%s3118_s13 + $0xe8] sm:$0xff]  }
  0x53   : > { %v679_v33 = vadd.f32 %v3136_v13, %v608_v26  ;;  %v609_v34 = vadd.f32 %v2547_v25, %v2419_v20  ;;  %v2424_v35 = vunpack.c.h.bf16 %v2601_v18  ;;  %v2551_v37 = vunpack.c.l.bf16 %v2632_v22  ;;  %v2606_v26 = vld [vmem:[%s3118_s13 + $0xf0] sm:$0xff]  }
  0x54   : > { %v799_v39 = vpack.c.bf16 %v741_v1, %v740_v24  ;;  %v742_v51 = vmax.f32 %v678_v27, 0.0  ;;  %v610_v40 = vadd.f32 %v2548_v28, %v2420_v21  ;;  %v2552_v41 = vunpack.c.h.bf16 %v2632_v22  ;;  %v2637_v28 = vld [vmem:[%s3123_s16 + $0xf0] sm:$0xff]  }
  0x55   : > { %v743_v42 = vmax.f32 %v679_v33, 0.0  ;;  %v680_v43 = vadd.f32 %v3136_v13, %v609_v34  ;;  %v611_v44 = vadd.f32 %v2551_v37, %v2423_v29  ;;  %v2427_v45 = vunpack.c.l.bf16 %v2602_v30  ;;  %2846 = vmatpush3.bf16.msra.mxu1 %v3034_v10  ;;  %v3037_v10 = vld [vmem:[%s3741_s3 + $0x70] sm:$0xff]  }
  0x56   : > { %v681_v55 = vadd.f32 %v3136_v13, %v610_v40  ;;  %v612_v47 = vadd.f32 %v2552_v41, %v2424_v35  ;;  %v2428_v48 = vunpack.c.h.bf16 %v2602_v30  ;;  %v2555_v49 = vunpack.c.l.bf16 %v2633_v36  ;;  %2847 = vmatprep.subr.bf16.mxu1 %v3035_v32  ;;  %2800 = vmatmul.mubr.bf16.gmra.mrb[24].mxu0 %v3247_v31  ;;  %v2636_v31 = vld [vmem:[%s3123_s16 + $0xe8] sm:$0xff]  }
  0x57   : > { %v800_v54 = vpack.c.bf16 %v743_v42, %v742_v51  ;;  %v744_v56 = vmax.f32 %v680_v43, 0.0  ;;  %v682_v57 = vadd.f32 %v3136_v13, %v611_v44  ;;  %v2556_v38 = vunpack.c.h.bf16 %v2633_v36  ;;  %2803 = vmatprep.mubr.bf16.mxu0 %v3253_v62  ;;  %v2638_v43 = vld [vmem:[%s3123_s16 + $0xf8] sm:$0xff]  }
  0x58   : > { %2816 = vmatmul.mubr.bf16.gmra.mrb[8].mxu1 %v798_v23  ;;  %v745_v58 = vmax.f32 %v681_v55, 0.0  ;;  %v683_v59 = vadd.f32 %v3136_v13, %v612_v47  ;;  %v613_v60 = vadd.f32 %v2555_v49, %v2427_v45  ;;  %v2431_v61 = vunpack.c.l.bf16 %v2603_v46 }
  0x59   : > { %2819 = vmatprep.mubr.bf16.mxu1 %v799_v39  ;;  %v746_v0 = vmax.f32 %v682_v57, 0.0  ;;  %v614_v2 = vadd.f32 %v2556_v38, %v2428_v48  ;;  %v2432_v3 = vunpack.c.h.bf16 %v2603_v46  ;;  %v2559_v4 = vunpack.c.l.bf16 %v2634_v50  ;;  %2848 = vmatpush3.bf16.msra.mxu1 %v3035_v32  ;;  %v2607_v39 = vld [vmem:[%s3118_s13 + $0xf8] sm:$0xff]  }
  0x5a   : > { %v801_v5 = vpack.c.bf16 %v745_v58, %v744_v56  ;;  %v747_v6 = vmax.f32 %v683_v59, 0.0  ;;  %v684_v7 = vadd.f32 %v3136_v13, %v613_v60  ;;  %v2560_v8 = vunpack.c.h.bf16 %v2634_v50  ;;  %2849 = vmatprep.subr.bf16.mxu1 %v3036_v52 }
  0x5b   : > { %v685_v11 = vadd.f32 %v3136_v13, %v614_v2  ;;  %v615_v12 = vadd.f32 %v2559_v4, %v2431_v61  ;;  %v2435_v15 = vunpack.c.l.bf16 %v2604_v63  ;;  %v2436_v17 = vunpack.c.h.bf16 %v2604_v63 }
  0x5c   : > { %v802_v18 = vpack.c.bf16 %v747_v6, %v746_v0  ;;  %v748_v19 = vmax.f32 %v684_v7, 0.0  ;;  %v616_v14 = vadd.f32 %v2560_v8, %v2432_v3  ;;  %v2563_v20 = vunpack.c.l.bf16 %v2635_v53 }
  0x5d   : > { %v749_v21 = vmax.f32 %v685_v11, 0.0  ;;  %v686_v22 = vadd.f32 %v3136_v13, %v615_v12  ;;  %v2564_v23 = vunpack.c.h.bf16 %v2635_v53  ;;  %v2439_v24 = vunpack.c.l.bf16 %v2605_v9  ;;  %2850 = vmatpush3.bf16.msra.mxu1 %v3036_v52 }
  0x5e   : > { %v687_v62 = vadd.f32 %v3136_v13, %v616_v14  ;;  %v617_v25 = vadd.f32 %v2563_v20, %v2435_v15  ;;  %v2440_v1 = vunpack.c.h.bf16 %v2605_v9  ;;  %v2567_v27 = vunpack.c.l.bf16 %v2636_v31  ;;  %2851 = vmatprep.subr.bf16.mxu1 %v3037_v10  ;;  %2804 = vmatmul.mubr.bf16.gmra.mrb[28].mxu0 %v3259_v16  ;;  %v3038_v9 = vld [vmem:[%s3741_s3 + $0x78] sm:$0xff]   ;;  %v3040_v14 = vld [vmem:[%s3743_s5 + $0x8] sm:$0xff]  }
  0x5f   : > { %v803_v29 = vpack.c.bf16 %v749_v21, %v748_v19  ;;  %v750_v30 = vmax.f32 %v686_v22, 0.0  ;;  %v618_v32 = vadd.f32 %v2564_v23, %v2436_v17  ;;  %v2568_v33 = vunpack.c.h.bf16 %v2636_v31  ;;  %v3039_v19 = vld [vmem:[%s3743_s5] sm:$0xff]  }
  0x60   : > { %2820 = vmatmul.mubr.bf16.gmra.mrb[12].mxu1 %v800_v54  ;;  %v751_v34 = vmax.f32 %v687_v62, 0.0  ;;  %v688_v35 = vadd.f32 %v3136_v13, %v617_v25  ;;  %v619_v37 = vadd.f32 %v2567_v27, %v2439_v24  ;;  %v2443_v36 = vunpack.c.l.bf16 %v2606_v26  ;;  %2919 = vmatprep.subr.bf16.mxu0 %v3039_v19  ;;  %v3041_v62 = vld [vmem:[%s3743_s5 + $0x10] sm:$0xff]  }
  0x61   : > { %2823 = vmatprep.mubr.bf16.mxu1 %v801_v5  ;;  %v689_v51 = vadd.f32 %v3136_v13, %v618_v32  ;;  %v620_v40 = vadd.f32 %v2568_v33, %v2440_v1  ;;  %v2444_v41 = vunpack.c.h.bf16 %v2606_v26  ;;  %v2571_v42 = vunpack.c.l.bf16 %v2637_v28  ;;  %2852 = vmatpush3.bf16.msra.mxu1 %v3037_v10  ;;  %v3349_v10 = vld [vmem:[%s3742_s4] ss:$0 sm:$0xff] }
  0x62   : > { %v804_v44 = vpack.c.bf16 %v751_v34, %v750_v30  ;;  %v752_v45 = vmax.f32 %v688_v35, 0.0  ;;  %v690_v46 = vadd.f32 %v3136_v13, %v619_v37  ;;  %v2572_v55 = vunpack.c.h.bf16 %v2637_v28  ;;  %2853 = vmatprep.subr.bf16.mxu1 %v3038_v9  ;;  %2920 = vmatpush3.bf16.msra.mxu0 %v3039_v19  ;;  %v3042_v34 = vld [vmem:[%s3743_s5 + $0x18] sm:$0xff]  }
  0x63   : > { %v753_v47 = vmax.f32 %v689_v51, 0.0  ;;  %v691_v48 = vadd.f32 %v3136_v13, %v620_v40  ;;  %v621_v49 = vadd.f32 %v2571_v42, %v2443_v36  ;;  %v2447_v50 = vunpack.c.l.bf16 %v2607_v39  ;;  %2921 = vmatprep.subr.bf16.mxu0 %v3040_v14 }
  0x64   : > { %v754_v52 = vmax.f32 %v690_v46, 0.0  ;;  %v622_v54 = vadd.f32 %v2572_v55, %v2444_v41  ;;  %v2448_v56 = vunpack.c.h.bf16 %v2607_v39  ;;  %v2575_v57 = vunpack.c.l.bf16 %v2638_v43  ;;  %v3043_v41 = vld [vmem:[%s3743_s5 + $0x20] sm:$0xff]  }
  0x65   : > { %v805_v38 = vpack.c.bf16 %v753_v47, %v752_v45  ;;  %v755_v58 = vmax.f32 %v691_v48, 0.0  ;;  %v692_v59 = vadd.f32 %v3136_v13, %v621_v49  ;;  %v2576_v60 = vunpack.c.h.bf16 %v2638_v43  ;;  %2854 = vmatpush3.bf16.msra.mxu1 %v3038_v9  ;;  %v3044_v49 = vld [vmem:[%s3743_s5 + $0x28] sm:$0xff]  }
  0x66   : > { %v693_v16 = vadd.f32 %v3136_v13, %v622_v54  ;;  %v623_v61 = vadd.f32 %v2575_v57, %v2447_v50  ;;  %2922 = vmatpush3.bf16.msra.mxu0 %v3040_v14 }
  0x67   : > { %v806_v63 = vpack.c.bf16 %v755_v58, %v754_v52  ;;  %v756_v0 = vmax.f32 %v692_v59, 0.0  ;;  %v624_v2 = vadd.f32 %v2576_v60, %v2448_v56  ;;  %2923 = vmatprep.subr.bf16.mxu0 %v3041_v62  ;;  %v3045_v58 = vld [vmem:[%s3743_s5 + $0x30] sm:$0xff]  }
  0x68   : > { %2824 = vmatmul.mubr.bf16.gmra.mrb[16].mxu1 %v802_v18  ;;  %v757_v3 = vmax.f32 %v693_v16, 0.0  ;;  %v694_v4 = vadd.f32 %v3136_v13, %v623_v61 }
  0x69   : > { %2827 = vmatprep.mubr.bf16.mxu1 %v803_v29  ;;  %v695_v53 = vadd.f32 %v3136_v13, %v624_v2 }
  0x6a   : > { %v807_v5 = vpack.c.bf16 %v757_v3, %v756_v0  ;;  %v758_v6 = vmax.f32 %v694_v4, 0.0  ;;  %2924 = vmatpush3.bf16.msra.mxu0 %v3041_v62 }
  0x6b   : > { %v759_v7 = vmax.f32 %v695_v53, 0.0  ;;  %2925 = vmatprep.subr.bf16.mxu0 %v3042_v34 }
  0x6d   : > { %v808_v8 = vpack.c.bf16 %v759_v7, %v758_v6 }
  0x6e   : > { %2926 = vmatpush3.bf16.msra.mxu0 %v3042_v34 }
  0x6f   : > { %2927 = vmatprep.subr.bf16.mxu0 %v3043_v41 }
  0x70   : > { %2828 = vmatmul.mubr.bf16.gmra.mrb[20].mxu1 %v804_v44 }
  0x71   : > { %2831 = vmatprep.mubr.bf16.mxu1 %v805_v38 }
  0x72   : > { %2928 = vmatpush3.bf16.msra.mxu0 %v3043_v41 }
  0x73   : > { %2929 = vmatprep.subr.bf16.mxu0 %v3044_v49 }
  0x76   : > { %2930 = vmatpush3.bf16.msra.mxu0 %v3044_v49 }
  0x77   : > { %2931 = vmatprep.subr.bf16.mxu0 %v3045_v58 }
  0x78   : > { %2832 = vmatmul.mubr.bf16.gmra.mrb[24].mxu1 %v806_v63 }
  0x79   : > { %2835 = vmatprep.mubr.bf16.mxu1 %v807_v5 }
  0x7a   : > { %2932 = vmatpush3.bf16.msra.mxu0 %v3045_v58 }
  0x80   : > { %2836 = vmatmul.mubr.bf16.gmra.mrb[28].mxu1 %v808_v8 }
  0xf9   : > { %v2777_v13 = vpop.f32.mrb[0].mxu0 }
  0xfa   : > { %v906_v11 = vadd.f32 %v2777_v13, %v3349_v10  ;;  %v897_v12 = vpop.f32.mrb[1].mxu0 }
  0xfb   : > { %v898_v15 = vadd.f32 %v3349_v10, %v897_v12  ;;  %v2778_v17 = vpop.f32.mrb[2].mxu0 }
  0xfc   : > { %v909_v31 = vadd.f32 %v2778_v17, %v3349_v10  ;;  %v900_v18 = vpop.f32.mrb[3].mxu0  ;;  %v1154_v21 = vmax.f32 %v906_v11, 0.0 }
  0xfd   : > { %v901_v20 = vadd.f32 %v3349_v10, %v900_v18  ;;  %v1152_v23 = vmax.f32 %v898_v15, 0.0 }
  0xfe   : > { %v1155_v22 = vmax.f32 %v909_v31, 0.0 }
  0xff   : > { %v1153_v24 = vmax.f32 %v901_v20, 0.0 }
 0x100   : > { %v1236_v26 = vpack.c.bf16 %v1155_v22, %v1154_v21 }
 0x101   : > { %v1235_v25 = vpack.c.bf16 %v1153_v24, %v1152_v23  ;;  %v2781_v1 = vpop.f32.mrb[4].mxu0 }
 0x102   : > { %v922_v27 = vadd.f32 %v2781_v1, %v3349_v10  ;;  %v913_v28 = vpop.f32.mrb[5].mxu0 }
 0x103   : > { %v914_v29 = vadd.f32 %v3349_v10, %v913_v28  ;;  %v2782_v30 = vpop.f32.mrb[6].mxu0  ;;  %2855 = vmatprep.mubr.bf16.mxu1 %v1235_v25 }
 0x104   : > { %v925_v32 = vadd.f32 %v2782_v30, %v3349_v10  ;;  %v916_v33 = vpop.f32.mrb[7].mxu0  ;;  %2856 = vmatmul.mubr.bf16.vlgmr.msra.gmra.mrb[32].mxu1 %v1236_v26  ;;  %v1158_v37 = vmax.f32 %v922_v27, 0.0 }
 0x105   : > { %v917_v35 = vadd.f32 %v3349_v10, %v916_v33  ;;  %v1156_v39 = vmax.f32 %v914_v29, 0.0 }
 0x106   : > { %v1159_v36 = vmax.f32 %v925_v32, 0.0 }
 0x107   : > { %v1157_v51 = vmax.f32 %v917_v35, 0.0 }
 0x108   : > { %v1238_v40 = vpack.c.bf16 %v1159_v36, %v1158_v37 }
 0x109   : > { %v1237_v42 = vpack.c.bf16 %v1157_v51, %v1156_v39  ;;  %v2785_v43 = vpop.f32.mrb[8].mxu0 }
 0x10a   : > { %v938_v44 = vadd.f32 %v2785_v43, %v3349_v10  ;;  %v929_v45 = vpop.f32.mrb[9].mxu0 }
 0x10b   : > { %v930_v46 = vadd.f32 %v3349_v10, %v929_v45  ;;  %v2786_v55 = vpop.f32.mrb[10].mxu0  ;;  %2859 = vmatprep.mubr.bf16.mxu1 %v1237_v42 }
 0x10c   : > { %v941_v47 = vadd.f32 %v2786_v55, %v3349_v10  ;;  %v932_v48 = vpop.f32.mrb[11].mxu0  ;;  %2860 = vmatmul.mubr.bf16.gmra.mrb[36].mxu1 %v1238_v40  ;;  %v1162_v52 = vmax.f32 %v938_v44, 0.0 }
 0x10d   : > { %v933_v50 = vadd.f32 %v3349_v10, %v932_v48  ;;  %v1160_v56 = vmax.f32 %v930_v46, 0.0 }
 0x10e   : > { %v1163_v54 = vmax.f32 %v941_v47, 0.0 }
 0x10f   : > { %v1161_v57 = vmax.f32 %v933_v50, 0.0 }
 0x110   : > { %v1240_v38 = vpack.c.bf16 %v1163_v54, %v1162_v52 }
 0x111   : > { %v1239_v59 = vpack.c.bf16 %v1161_v57, %v1160_v56  ;;  %v2789_v60 = vpop.f32.mrb[12].mxu0 }
 0x112   : > { %v954_v16 = vadd.f32 %v2789_v60, %v3349_v10  ;;  %v945_v61 = vpop.f32.mrb[13].mxu0 }
 0x113   : > { %v946_v63 = vadd.f32 %v3349_v10, %v945_v61  ;;  %v2790_v0 = vpop.f32.mrb[14].mxu0  ;;  %2863 = vmatprep.mubr.bf16.mxu1 %v1239_v59 }
 0x114   : > { %v957_v2 = vadd.f32 %v2790_v0, %v3349_v10  ;;  %v948_v3 = vpop.f32.mrb[15].mxu0  ;;  %2864 = vmatmul.mubr.bf16.gmra.mrb[40].mxu1 %v1240_v38  ;;  %v1166_v53 = vmax.f32 %v954_v16, 0.0 }
 0x115   : > { %v949_v4 = vadd.f32 %v3349_v10, %v948_v3  ;;  %v1164_v6 = vmax.f32 %v946_v63, 0.0 }
 0x116   : > { %v1167_v5 = vmax.f32 %v957_v2, 0.0 }
 0x117   : > { %v1165_v7 = vmax.f32 %v949_v4, 0.0 }
 0x118   : > { %v1242_v9 = vpack.c.bf16 %v1167_v5, %v1166_v53 }
 0x119   : > { %v1241_v12 = vpack.c.bf16 %v1165_v7, %v1164_v6  ;;  %v2793_v15 = vpop.f32.mrb[16].mxu0 }
 0x11a   : > { %v970_v18 = vadd.f32 %v2793_v15, %v3349_v10  ;;  %v961_v19 = vpop.f32.mrb[17].mxu0 }
 0x11b   : > { %v2809_v8 = vpop.f32.mrb[0].mxu1  ;;  %v962_v22 = vadd.f32 %v3349_v10, %v961_v19  ;;  %v2794_v23 = vpop.f32.mrb[18].mxu0  ;;  %2867 = vmatprep.mubr.bf16.mxu1 %v1241_v12 }
 0x11c   : > { %v1034_v13 = vadd.f32 %v2809_v8, %v3349_v10  ;;  %v1025_v11 = vpop.f32.mrb[1].mxu1  ;;  %v973_v62 = vadd.f32 %v2794_v23, %v3349_v10  ;;  %v964_v25 = vpop.f32.mrb[19].mxu0  ;;  %2868 = vmatmul.mubr.bf16.gmra.mrb[44].mxu1 %v1242_v9  ;;  %v1170_v29 = vmax.f32 %v970_v18, 0.0 }
 0x11d   : > { %v1026_v17 = vadd.f32 %v3349_v10, %v1025_v11  ;;  %v2810_v31 = vpop.f32.mrb[2].mxu1  ;;  %v965_v27 = vadd.f32 %v3349_v10, %v964_v25  ;;  %v1168_v33 = vmax.f32 %v962_v22, 0.0 }
 0x11e   : > { %v1186_v14 = vmax.f32 %v1034_v13, 0.0  ;;  %v1037_v20 = vadd.f32 %v2810_v31, %v3349_v10  ;;  %v1028_v21 = vpop.f32.mrb[3].mxu1  ;;  %v1171_v30 = vmax.f32 %v973_v62, 0.0 }
 0x11f   : > { %v1184_v24 = vmax.f32 %v1026_v17, 0.0  ;;  %v1029_v26 = vadd.f32 %v3349_v10, %v1028_v21  ;;  %v1169_v34 = vmax.f32 %v965_v27, 0.0 }
 0x120   : > { %v1187_v1 = vmax.f32 %v1037_v20, 0.0  ;;  %v1244_v36 = vpack.c.bf16 %v1171_v30, %v1170_v29 }
 0x121   : > { %v1185_v28 = vmax.f32 %v1029_v26, 0.0  ;;  %v1243_v40 = vpack.c.bf16 %v1169_v34, %v1168_v33  ;;  %v2797_v41 = vpop.f32.mrb[20].mxu0 }
 0x122   : > { %v3396_v32 = vpack.c.bf16 %v1187_v1, %v1186_v14  ;;  %v986_v44 = vadd.f32 %v2797_v41, %v3349_v10  ;;  %v977_v45 = vpop.f32.mrb[21].mxu0 }
 0x123   : > { %v3398_v35 = vpack.c.bf16 %v1185_v28, %v1184_v24  ;;  %v2813_v37 = vpop.f32.mrb[4].mxu1  ;;  %v978_v48 = vadd.f32 %v3349_v10, %v977_v45  ;;  %v2798_v49 = vpop.f32.mrb[22].mxu0  ;;  %2871 = vmatprep.mubr.bf16.mxu1 %v1243_v40 }
 0x124   : > { %v1050_v39 = vadd.f32 %v2813_v37, %v3349_v10  ;;  %v1041_v51 = vpop.f32.mrb[5].mxu1  ;;  %v989_v54 = vadd.f32 %v2798_v49, %v3349_v10  ;;  %v980_v56 = vpop.f32.mrb[23].mxu0  ;;  %2872 = vmatmul.mubr.bf16.gmra.mrb[48].mxu1 %v1244_v36  ;;  %v1174_v59 = vmax.f32 %v986_v44, 0.0 }
 0x125   : > { %v1042_v42 = vadd.f32 %v3349_v10, %v1041_v51  ;;  %v2814_v43 = vpop.f32.mrb[6].mxu1  ;;  %v981_v38 = vadd.f32 %v3349_v10, %v980_v56  ;;  %v1172_v61 = vmax.f32 %v978_v48, 0.0 }
 0x126   : > { %v1190_v46 = vmax.f32 %v1050_v39, 0.0  ;;  %v1053_v55 = vadd.f32 %v2814_v43, %v3349_v10  ;;  %v1044_v47 = vpop.f32.mrb[7].mxu1  ;;  %v1175_v60 = vmax.f32 %v989_v54, 0.0 }
 0x127   : > { %v1188_v50 = vmax.f32 %v1042_v42, 0.0  ;;  %v1045_v52 = vadd.f32 %v3349_v10, %v1044_v47  ;;  %v1173_v63 = vmax.f32 %v981_v38, 0.0 }
 0x128   : > { %v1191_v57 = vmax.f32 %v1053_v55, 0.0  ;;  %v1246_v3 = vpack.c.bf16 %v1175_v60, %v1174_v59 }
 0x129   : > { %v1189_v58 = vmax.f32 %v1045_v52, 0.0  ;;  %v1245_v5 = vpack.c.bf16 %v1173_v63, %v1172_v61  ;;  %v2801_v6 = vpop.f32.mrb[24].mxu0 }
 0x12a   : > { %v3408_v16 = vpack.c.bf16 %v1191_v57, %v1190_v46  ;;  %v1002_v9 = vadd.f32 %v2801_v6, %v3349_v10  ;;  %v993_v13 = vpop.f32.mrb[25].mxu0 }
 0x12b   : > { %v3410_v0 = vpack.c.bf16 %v1189_v58, %v1188_v50  ;;  %v2817_v2 = vpop.f32.mrb[8].mxu1  ;;  %v994_v17 = vadd.f32 %v3349_v10, %v993_v13  ;;  %v2802_v31 = vpop.f32.mrb[26].mxu0  ;;  %2875 = vmatprep.mubr.bf16.mxu1 %v1245_v5 }
 0x12c   : > { %v1066_v4 = vadd.f32 %v2817_v2, %v3349_v10  ;;  %v1057_v53 = vpop.f32.mrb[9].mxu1  ;;  %v1005_v14 = vadd.f32 %v2802_v31, %v3349_v10  ;;  %v996_v20 = vpop.f32.mrb[27].mxu0  ;;  %2876 = vmatmul.mubr.bf16.gmra.mrb[52].mxu1 %v1246_v3  ;;  %v1178_v24 = vmax.f32 %v1002_v9, 0.0 }
 0x12d   : > { %v1058_v7 = vadd.f32 %v3349_v10, %v1057_v53  ;;  %v2818_v8 = vpop.f32.mrb[10].mxu1  ;;  %v997_v22 = vadd.f32 %v3349_v10, %v996_v20  ;;  %v1176_v25 = vmax.f32 %v994_v17, 0.0 }
 0x12e   : > { %v1194_v11 = vmax.f32 %v1066_v4, 0.0  ;;  %v1069_v12 = vadd.f32 %v2818_v8, %v3349_v10  ;;  %v1060_v15 = vpop.f32.mrb[11].mxu1  ;;  %v1179_v26 = vmax.f32 %v1005_v14, 0.0 }
 0x12f   : > { %v1192_v18 = vmax.f32 %v1058_v7, 0.0  ;;  %v1061_v19 = vadd.f32 %v3349_v10, %v1060_v15  ;;  %v1177_v1 = vmax.f32 %v997_v22, 0.0 }
 0x130   : > { %v1195_v21 = vmax.f32 %v1069_v12, 0.0  ;;  %v1248_v29 = vpack.c.bf16 %v1179_v26, %v1178_v24 }
 0x131   : > { %v1193_v23 = vmax.f32 %v1061_v19, 0.0  ;;  %v1247_v34 = vpack.c.bf16 %v1177_v1, %v1176_v25  ;;  %v2805_v37 = vpop.f32.mrb[28].mxu0 }
 0x132   : > { %v3420_v62 = vpack.c.bf16 %v1195_v21, %v1194_v11  ;;  %v1018_v51 = vadd.f32 %v2805_v37, %v3349_v10  ;;  %v1009_v40 = vpop.f32.mrb[29].mxu0 }
 0x133   : > { %v3422_v27 = vpack.c.bf16 %v1193_v23, %v1192_v18  ;;  %v2821_v28 = vpop.f32.mrb[12].mxu1  ;;  %v1010_v44 = vadd.f32 %v3349_v10, %v1009_v40  ;;  %v2806_v45 = vpop.f32.mrb[30].mxu0  ;;  %2879 = vmatprep.mubr.bf16.mxu1 %v1247_v34 }
 0x134   : > { %v1082_v30 = vadd.f32 %v2821_v28, %v3349_v10  ;;  %v1073_v33 = vpop.f32.mrb[13].mxu1  ;;  %v1021_v47 = vadd.f32 %v2806_v45, %v3349_v10  ;;  %v1012_v48 = vpop.f32.mrb[31].mxu0  ;;  %2880 = vmatmul.mubr.bf16.gmra.mrb[56].mxu1 %v1248_v29  ;;  %v1182_v54 = vmax.f32 %v1018_v51, 0.0 }
 0x135   : > { %v1074_v36 = vadd.f32 %v3349_v10, %v1073_v33  ;;  %v2822_v39 = vpop.f32.mrb[14].mxu1  ;;  %v1013_v50 = vadd.f32 %v3349_v10, %v1012_v48  ;;  %v1180_v38 = vmax.f32 %v1010_v44, 0.0 }
 0x136   : > { %v1198_v41 = vmax.f32 %v1082_v30, 0.0  ;;  %v1085_v42 = vadd.f32 %v2822_v39, %v3349_v10  ;;  %v1076_v43 = vpop.f32.mrb[15].mxu1  ;;  %v1183_v56 = vmax.f32 %v1021_v47, 0.0 }
 0x137   : > { %v1196_v46 = vmax.f32 %v1074_v36, 0.0  ;;  %v1077_v55 = vadd.f32 %v3349_v10, %v1076_v43  ;;  %v1181_v58 = vmax.f32 %v1013_v50, 0.0 }
 0x138   : > { %v1199_v49 = vmax.f32 %v1085_v42, 0.0  ;;  %v1250_v61 = vpack.c.bf16 %v1183_v56, %v1182_v54 }
 0x139   : > { %v1197_v52 = vmax.f32 %v1077_v55, 0.0  ;;  %v1249_v3 = vpack.c.bf16 %v1181_v58, %v1180_v38  ;;  %v3046_v38 = vld [vmem:[%s3743_s5 + $0x38] sm:$0xff]  }
 0x13a   : > { %v3432_v57 = vpack.c.bf16 %v1199_v49, %v1198_v41  ;;  %2933 = vmatprep.subr.bf16.mxu0 %v3046_v38 }
 0x13b   : > { %v3434_v59 = vpack.c.bf16 %v1197_v52, %v1196_v46  ;;  %v2825_v60 = vpop.f32.mrb[16].mxu1  ;;  %2883 = vmatprep.mubr.bf16.mxu1 %v1249_v3  ;;  %2934 = vmatpush3.bf16.msra.mxu0 %v3046_v38 }
 0x13c   : > { %v1098_v63 = vadd.f32 %v2825_v60, %v3349_v10  ;;  %v1089_v2 = vpop.f32.mrb[17].mxu1  ;;  %2884 = vmatmul.mubr.bf16.gmra.mrb[60].mxu1 %v1250_v61 }
 0x13d   : > { %v1090_v4 = vadd.f32 %v3349_v10, %v1089_v2  ;;  %v2826_v53 = vpop.f32.mrb[18].mxu1  ;;  %2887 = vmatprep.mubr.bf16.mxu1 %v3398_v35 }
 0x13e   : > { %v1202_v5 = vmax.f32 %v1098_v63, 0.0  ;;  %v1101_v6 = vadd.f32 %v2826_v53, %v3349_v10  ;;  %v1092_v7 = vpop.f32.mrb[19].mxu1 }
 0x13f   : > { %v1200_v8 = vmax.f32 %v1090_v4, 0.0  ;;  %v1093_v9 = vadd.f32 %v3349_v10, %v1092_v7 }
 0x140   : > { %v1203_v13 = vmax.f32 %v1101_v6, 0.0 }
 0x141   : > { %v1201_v11 = vmax.f32 %v1093_v9, 0.0 }
 0x142   : > { %v1260_v12 = vpack.c.bf16 %v1203_v13, %v1202_v5 }
 0x143   : > { %v1259_v15 = vpack.c.bf16 %v1201_v11, %v1200_v8  ;;  %v2829_v17 = vpop.f32.mrb[20].mxu1 }
 0x144   : > { %v1114_v31 = vadd.f32 %v2829_v17, %v3349_v10  ;;  %v1105_v18 = vpop.f32.mrb[21].mxu1  ;;  %2888 = vmatmul.mubr.bf16.gmra.mrb[64].mxu1 %v3396_v32 }
 0x145   : > { %v1106_v19 = vadd.f32 %v3349_v10, %v1105_v18  ;;  %v2830_v14 = vpop.f32.mrb[22].mxu1  ;;  %2891 = vmatprep.mubr.bf16.mxu1 %v3410_v0 }
 0x146   : > { %v1206_v20 = vmax.f32 %v1114_v31, 0.0  ;;  %v1117_v21 = vadd.f32 %v2830_v14, %v3349_v10  ;;  %v1108_v22 = vpop.f32.mrb[23].mxu1 }
 0x147   : > { %v1204_v23 = vmax.f32 %v1106_v19, 0.0  ;;  %v1109_v24 = vadd.f32 %v3349_v10, %v1108_v22 }
 0x148   : > { %v1207_v35 = vmax.f32 %v1117_v21, 0.0 }
 0x149   : > { %v1205_v26 = vmax.f32 %v1109_v24, 0.0 }
 0x14a   : > { %v1262_v25 = vpack.c.bf16 %v1207_v35, %v1206_v20 }
 0x14b   : > { %v1261_v1 = vpack.c.bf16 %v1205_v26, %v1204_v23  ;;  %v2833_v28 = vpop.f32.mrb[24].mxu1 }
 0x14c   : > { %v1130_v29 = vadd.f32 %v2833_v28, %v3349_v10  ;;  %v1121_v30 = vpop.f32.mrb[25].mxu1  ;;  %2892 = vmatmul.mubr.bf16.gmra.mrb[68].mxu1 %v3408_v16 }
 0x14d   : > { %v1122_v33 = vadd.f32 %v3349_v10, %v1121_v30  ;;  %v2834_v34 = vpop.f32.mrb[26].mxu1  ;;  %2895 = vmatprep.mubr.bf16.mxu1 %v3422_v27 }
 0x14e   : > { %v1210_v37 = vmax.f32 %v1130_v29, 0.0  ;;  %v1133_v36 = vadd.f32 %v2834_v34, %v3349_v10  ;;  %v1124_v39 = vpop.f32.mrb[27].mxu1 }
 0x14f   : > { %v1208_v51 = vmax.f32 %v1122_v33, 0.0  ;;  %v1125_v32 = vadd.f32 %v3349_v10, %v1124_v39 }
 0x150   : > { %v1211_v0 = vmax.f32 %v1133_v36, 0.0 }
 0x151   : > { %v1209_v40 = vmax.f32 %v1125_v32, 0.0 }
 0x152   : > { %v1264_v41 = vpack.c.bf16 %v1211_v0, %v1210_v37 }
 0x153   : > { %v1263_v42 = vpack.c.bf16 %v1209_v40, %v1208_v51  ;;  %v2837_v43 = vpop.f32.mrb[28].mxu1 }
 0x154   : > { %v1146_v44 = vadd.f32 %v2837_v43, %v3349_v10  ;;  %v1137_v45 = vpop.f32.mrb[29].mxu1  ;;  %2896 = vmatmul.mubr.bf16.gmra.mrb[72].mxu1 %v3420_v62 }
 0x155   : > { %v1138_v46 = vadd.f32 %v3349_v10, %v1137_v45  ;;  %v2838_v55 = vpop.f32.mrb[30].mxu1  ;;  %2899 = vmatprep.mubr.bf16.mxu1 %v3434_v59 }
 0x156   : > { %v1214_v47 = vmax.f32 %v1146_v44, 0.0  ;;  %v1149_v48 = vadd.f32 %v2838_v55, %v3349_v10  ;;  %v1140_v49 = vpop.f32.mrb[31].mxu1 }
 0x157   : > { %v1212_v50 = vmax.f32 %v1138_v46, 0.0  ;;  %v1141_v16 = vadd.f32 %v3349_v10, %v1140_v49  ;;  %v3466_v10 = vld [vmem:[%s3742_s4 + $0x1] ss:$0 sm:$0xff] }
 0x158   : > { %v1215_v27 = vmax.f32 %v1149_v48, 0.0 }
 0x159   : > { %v1213_v52 = vmax.f32 %v1141_v16, 0.0 }
 0x15a   : > { %v1266_v54 = vpack.c.bf16 %v1215_v27, %v1214_v47 }
 0x15b   : > { %v1265_v56 = vpack.c.bf16 %v1213_v52, %v1212_v50 }
 0x15c   : > { %2900 = vmatmul.mubr.bf16.gmra.mrb[76].mxu1 %v3432_v57 }
 0x15d   : > { %2903 = vmatprep.mubr.bf16.mxu1 %v1259_v15 }
 0x164   : > { %2904 = vmatmul.mubr.bf16.gmra.mrb[80].mxu1 %v1260_v12 }
 0x165   : > { %2907 = vmatprep.mubr.bf16.mxu1 %v1261_v1 }
 0x16c   : > { %2908 = vmatmul.mubr.bf16.gmra.mrb[84].mxu1 %v1262_v25 }
 0x16d   : > { %2911 = vmatprep.mubr.bf16.mxu1 %v1263_v42 }
 0x174   : > { %2912 = vmatmul.mubr.bf16.gmra.mrb[88].mxu1 %v1264_v41 }
 0x175   : > { %2915 = vmatprep.mubr.bf16.mxu1 %v1265_v56 }
 0x17c   : > { %2916 = vmatmul.mubr.bf16.gmra.mrb[92].mxu1 %v1266_v54 }
 0x1d7   : > { %v2857_v62 = vpop.f32.mrb[32].mxu1 }
 0x1d8   : > { %v1364_v57 = vadd.f32 %v2857_v62, %v3466_v10  ;;  %v1355_v58 = vpop.f32.mrb[33].mxu1 }
 0x1d9   : > { %v1356_v59 = vadd.f32 %v3466_v10, %v1355_v58  ;;  %v2858_v60 = vpop.f32.mrb[34].mxu1 }
 0x1da   : > { %v1367_v61 = vadd.f32 %v2858_v60, %v3466_v10  ;;  %v1358_v63 = vpop.f32.mrb[35].mxu1  ;;  %v1612_v3 = vmax.f32 %v1364_v57, 0.0 }
 0x1db   : > { %v1359_v2 = vadd.f32 %v3466_v10, %v1358_v63  ;;  %v1610_v53 = vmax.f32 %v1356_v59, 0.0 }
 0x1dc   : > { %v1613_v4 = vmax.f32 %v1367_v61, 0.0 }
 0x1dd   : > { %v1611_v5 = vmax.f32 %v1359_v2, 0.0 }
 0x1de   : > { %v1675_v6 = vpack.c.bf16 %v1613_v4, %v1612_v3 }
 0x1df   : > { %v1674_v7 = vpack.c.bf16 %v1611_v5, %v1610_v53  ;;  %v2861_v8 = vpop.f32.mrb[36].mxu1 }
 0x1e0   : > { %v1380_v9 = vadd.f32 %v2861_v8, %v3466_v10  ;;  %v1371_v13 = vpop.f32.mrb[37].mxu1 }
 0x1e1   : > { %v1372_v11 = vadd.f32 %v3466_v10, %v1371_v13  ;;  %v2862_v12 = vpop.f32.mrb[38].mxu1  ;;  %2935 = vmatprep.mubr.bf16.mxu0 %v1674_v7 }
 0x1e2   : > { %v1383_v15 = vadd.f32 %v2862_v12, %v3466_v10  ;;  %v1374_v17 = vpop.f32.mrb[39].mxu1  ;;  %2936 = vmatmul.mubr.bf16.vlgmr.msra.gmra.mrb[32].mxu0 %v1675_v6  ;;  %v1616_v18 = vmax.f32 %v1380_v9, 0.0 }
 0x1e3   : > { %v1375_v31 = vadd.f32 %v3466_v10, %v1374_v17  ;;  %v1614_v14 = vmax.f32 %v1372_v11, 0.0 }
 0x1e4   : > { %v1617_v19 = vmax.f32 %v1383_v15, 0.0 }
 0x1e5   : > { %v1615_v20 = vmax.f32 %v1375_v31, 0.0 }
 0x1e6   : > { %v1677_v21 = vpack.c.bf16 %v1617_v19, %v1616_v18 }
 0x1e7   : > { %v1676_v22 = vpack.c.bf16 %v1615_v20, %v1614_v14  ;;  %v2865_v23 = vpop.f32.mrb[40].mxu1 }
 0x1e8   : > { %v1396_v24 = vadd.f32 %v2865_v23, %v3466_v10  ;;  %v1387_v35 = vpop.f32.mrb[41].mxu1 }
 0x1e9   : > { %v1388_v26 = vadd.f32 %v3466_v10, %v1387_v35  ;;  %v2866_v25 = vpop.f32.mrb[42].mxu1  ;;  %2939 = vmatprep.mubr.bf16.mxu0 %v1676_v22 }
 0x1ea   : > { %v1399_v1 = vadd.f32 %v2866_v25, %v3466_v10  ;;  %v1390_v28 = vpop.f32.mrb[43].mxu1  ;;  %2940 = vmatmul.mubr.bf16.gmra.mrb[36].mxu0 %v1677_v21  ;;  %v1620_v30 = vmax.f32 %v1396_v24, 0.0 }
 0x1eb   : > { %v1391_v29 = vadd.f32 %v3466_v10, %v1390_v28  ;;  %v1618_v34 = vmax.f32 %v1388_v26, 0.0 }
 0x1ec   : > { %v1621_v33 = vmax.f32 %v1399_v1, 0.0 }
 0x1ed   : > { %v1619_v37 = vmax.f32 %v1391_v29, 0.0 }
 0x1ee   : > { %v1679_v36 = vpack.c.bf16 %v1621_v33, %v1620_v30 }
 0x1ef   : > { %v1678_v39 = vpack.c.bf16 %v1619_v37, %v1618_v34  ;;  %v2869_v51 = vpop.f32.mrb[44].mxu1 }
 0x1f0   : > { %v1412_v32 = vadd.f32 %v2869_v51, %v3466_v10  ;;  %v1403_v0 = vpop.f32.mrb[45].mxu1 }
 0x1f1   : > { %v1404_v40 = vadd.f32 %v3466_v10, %v1403_v0  ;;  %v2870_v41 = vpop.f32.mrb[46].mxu1  ;;  %2943 = vmatprep.mubr.bf16.mxu0 %v1678_v39 }
 0x1f2   : > { %v1415_v42 = vadd.f32 %v2870_v41, %v3466_v10  ;;  %v1406_v43 = vpop.f32.mrb[47].mxu1  ;;  %2944 = vmatmul.mubr.bf16.gmra.mrb[40].mxu0 %v1679_v36  ;;  %v1624_v45 = vmax.f32 %v1412_v32, 0.0 }
 0x1f3   : > { %v1407_v44 = vadd.f32 %v3466_v10, %v1406_v43  ;;  %v1622_v55 = vmax.f32 %v1404_v40, 0.0 }
 0x1f4   : > { %v1625_v46 = vmax.f32 %v1415_v42, 0.0 }
 0x1f5   : > { %v1623_v47 = vmax.f32 %v1407_v44, 0.0 }
 0x1f6   : > { %v1681_v48 = vpack.c.bf16 %v1625_v46, %v1624_v45 }
 0x1f7   : > { %v1680_v49 = vpack.c.bf16 %v1623_v47, %v1622_v55  ;;  %v2873_v50 = vpop.f32.mrb[48].mxu1 }
 0x1f8   : > { %v1428_v16 = vadd.f32 %v2873_v50, %v3466_v10  ;;  %v1419_v27 = vpop.f32.mrb[49].mxu1 }
 0x1f9   : > { %v1420_v52 = vadd.f32 %v3466_v10, %v1419_v27  ;;  %v2874_v54 = vpop.f32.mrb[50].mxu1  ;;  %2947 = vmatprep.mubr.bf16.mxu0 %v1680_v49 }
 0x1fa   : > { %v1431_v56 = vadd.f32 %v2874_v54, %v3466_v10  ;;  %v1422_v38 = vpop.f32.mrb[51].mxu1  ;;  %2948 = vmatmul.mubr.bf16.gmra.mrb[44].mxu0 %v1681_v48  ;;  %v1628_v57 = vmax.f32 %v1428_v16, 0.0 }
 0x1fb   : > { %v1423_v62 = vadd.f32 %v3466_v10, %v1422_v38  ;;  %v1626_v59 = vmax.f32 %v1420_v52, 0.0 }
 0x1fc   : > { %v1629_v58 = vmax.f32 %v1431_v56, 0.0 }
 0x1fd   : > { %v1627_v60 = vmax.f32 %v1423_v62, 0.0 }
 0x1fe   : > { %v1683_v61 = vpack.c.bf16 %v1629_v58, %v1628_v57 }
 0x1ff   : > { %v1682_v63 = vpack.c.bf16 %v1627_v60, %v1626_v59  ;;  %v2877_v2 = vpop.f32.mrb[52].mxu1 }
 0x200   : > { %v1444_v3 = vadd.f32 %v2877_v2, %v3466_v10  ;;  %v1435_v4 = vpop.f32.mrb[53].mxu1 }
 0x201   : > { %v1436_v53 = vadd.f32 %v3466_v10, %v1435_v4  ;;  %v2878_v5 = vpop.f32.mrb[54].mxu1  ;;  %2951 = vmatprep.mubr.bf16.mxu0 %v1682_v63 }
 0x202   : > { %v1447_v6 = vadd.f32 %v2878_v5, %v3466_v10  ;;  %v1438_v7 = vpop.f32.mrb[55].mxu1  ;;  %2952 = vmatmul.mubr.bf16.gmra.mrb[48].mxu0 %v1683_v61  ;;  %v1632_v9 = vmax.f32 %v1444_v3, 0.0 }
 0x203   : > { %v1439_v8 = vadd.f32 %v3466_v10, %v1438_v7  ;;  %v1630_v11 = vmax.f32 %v1436_v53, 0.0 }
 0x204   : > { %v1633_v13 = vmax.f32 %v1447_v6, 0.0 }
 0x205   : > { %v1631_v12 = vmax.f32 %v1439_v8, 0.0 }
 0x206   : > { %v1685_v15 = vpack.c.bf16 %v1633_v13, %v1632_v9 }
 0x207   : > { %v1684_v17 = vpack.c.bf16 %v1631_v12, %v1630_v11  ;;  %v2881_v31 = vpop.f32.mrb[56].mxu1 }
 0x208   : > { %v1460_v18 = vadd.f32 %v2881_v31, %v3466_v10  ;;  %v1451_v19 = vpop.f32.mrb[57].mxu1 }
 0x209   : > { %v1452_v14 = vadd.f32 %v3466_v10, %v1451_v19  ;;  %v2882_v20 = vpop.f32.mrb[58].mxu1  ;;  %2955 = vmatprep.mubr.bf16.mxu0 %v1684_v17 }
 0x20a   : > { %v1463_v21 = vadd.f32 %v2882_v20, %v3466_v10  ;;  %v1454_v22 = vpop.f32.mrb[59].mxu1  ;;  %2956 = vmatmul.mubr.bf16.gmra.mrb[52].mxu0 %v1685_v15  ;;  %v1636_v24 = vmax.f32 %v1460_v18, 0.0 }
 0x20b   : > { %v1455_v23 = vadd.f32 %v3466_v10, %v1454_v22  ;;  %v1634_v26 = vmax.f32 %v1452_v14, 0.0 }
 0x20c   : > { %v1637_v35 = vmax.f32 %v1463_v21, 0.0 }
 0x20d   : > { %v1635_v25 = vmax.f32 %v1455_v23, 0.0 }
 0x20e   : > { %v1687_v1 = vpack.c.bf16 %v1637_v35, %v1636_v24 }
 0x20f   : > { %v1686_v28 = vpack.c.bf16 %v1635_v25, %v1634_v26  ;;  %v2885_v29 = vpop.f32.mrb[60].mxu1 }
 0x210   : > { %v1476_v30 = vadd.f32 %v2885_v29, %v3466_v10  ;;  %v1467_v33 = vpop.f32.mrb[61].mxu1 }
 0x211   : > { %v1468_v34 = vadd.f32 %v3466_v10, %v1467_v33  ;;  %v2886_v37 = vpop.f32.mrb[62].mxu1  ;;  %2959 = vmatprep.mubr.bf16.mxu0 %v1686_v28 }
 0x212   : > { %v1479_v36 = vadd.f32 %v2886_v37, %v3466_v10  ;;  %v1470_v39 = vpop.f32.mrb[63].mxu1  ;;  %2960 = vmatmul.mubr.bf16.gmra.mrb[56].mxu0 %v1687_v1  ;;  %v1640_v32 = vmax.f32 %v1476_v30, 0.0 }
 0x213   : > { %v1471_v51 = vadd.f32 %v3466_v10, %v1470_v39  ;;  %v1638_v40 = vmax.f32 %v1468_v34, 0.0 }
 0x214   : > { %v1641_v0 = vmax.f32 %v1479_v36, 0.0 }
 0x215   : > { %v1639_v41 = vmax.f32 %v1471_v51, 0.0 }
 0x216   : > { %v1689_v42 = vpack.c.bf16 %v1641_v0, %v1640_v32 }
 0x217   : > { %v1688_v43 = vpack.c.bf16 %v1639_v41, %v1638_v40  ;;  %v2889_v44 = vpop.f32.mrb[64].mxu1 }
 0x218   : > { %v1492_v45 = vadd.f32 %v2889_v44, %v3466_v10  ;;  %v1483_v46 = vpop.f32.mrb[65].mxu1 }
 0x219   : > { %v1484_v55 = vadd.f32 %v3466_v10, %v1483_v46  ;;  %v2890_v47 = vpop.f32.mrb[66].mxu1  ;;  %2963 = vmatprep.mubr.bf16.mxu0 %v1688_v43 }
 0x21a   : > { %v1495_v48 = vadd.f32 %v2890_v47, %v3466_v10  ;;  %v1486_v49 = vpop.f32.mrb[67].mxu1  ;;  %2964 = vmatmul.mubr.bf16.gmra.mrb[60].mxu0 %v1689_v42  ;;  %v1644_v16 = vmax.f32 %v1492_v45, 0.0 }
 0x21b   : > { %v1487_v50 = vadd.f32 %v3466_v10, %v1486_v49  ;;  %v1642_v52 = vmax.f32 %v1484_v55, 0.0 }
 0x21c   : > { %v1645_v27 = vmax.f32 %v1495_v48, 0.0 }
 0x21d   : > { %v1643_v54 = vmax.f32 %v1487_v50, 0.0 }
 0x21e   : > { %v1691_v56 = vpack.c.bf16 %v1645_v27, %v1644_v16 }
 0x21f   : > { %v1690_v38 = vpack.c.bf16 %v1643_v54, %v1642_v52  ;;  %v2893_v62 = vpop.f32.mrb[68].mxu1 }
 0x220   : > { %v1508_v57 = vadd.f32 %v2893_v62, %v3466_v10  ;;  %v1499_v58 = vpop.f32.mrb[69].mxu1 }
 0x221   : > { %v1500_v59 = vadd.f32 %v3466_v10, %v1499_v58  ;;  %v2894_v60 = vpop.f32.mrb[70].mxu1  ;;  %2967 = vmatprep.mubr.bf16.mxu0 %v1690_v38 }
 0x222   : > { %v1511_v61 = vadd.f32 %v2894_v60, %v3466_v10  ;;  %v1502_v63 = vpop.f32.mrb[71].mxu1  ;;  %2968 = vmatmul.mubr.bf16.gmra.mrb[64].mxu0 %v1691_v56  ;;  %v1648_v3 = vmax.f32 %v1508_v57, 0.0 }
 0x223   : > { %v1503_v2 = vadd.f32 %v3466_v10, %v1502_v63  ;;  %v1646_v53 = vmax.f32 %v1500_v59, 0.0 }
 0x224   : > { %v1649_v4 = vmax.f32 %v1511_v61, 0.0 }
 0x225   : > { %v1647_v5 = vmax.f32 %v1503_v2, 0.0 }
 0x226   : > { %v1693_v6 = vpack.c.bf16 %v1649_v4, %v1648_v3 }
 0x227   : > { %v1692_v7 = vpack.c.bf16 %v1647_v5, %v1646_v53  ;;  %v2897_v8 = vpop.f32.mrb[72].mxu1 }
 0x228   : > { %v1524_v9 = vadd.f32 %v2897_v8, %v3466_v10  ;;  %v1515_v13 = vpop.f32.mrb[73].mxu1 }
 0x229   : > { %v1516_v11 = vadd.f32 %v3466_v10, %v1515_v13  ;;  %v2898_v12 = vpop.f32.mrb[74].mxu1  ;;  %2971 = vmatprep.mubr.bf16.mxu0 %v1692_v7 }
 0x22a   : > { %v1527_v15 = vadd.f32 %v2898_v12, %v3466_v10  ;;  %v1518_v17 = vpop.f32.mrb[75].mxu1  ;;  %2972 = vmatmul.mubr.bf16.gmra.mrb[68].mxu0 %v1693_v6  ;;  %v1652_v18 = vmax.f32 %v1524_v9, 0.0 }
 0x22b   : > { %v1519_v31 = vadd.f32 %v3466_v10, %v1518_v17  ;;  %v1650_v14 = vmax.f32 %v1516_v11, 0.0 }
 0x22c   : > { %v1653_v19 = vmax.f32 %v1527_v15, 0.0 }
 0x22d   : > { %v1651_v20 = vmax.f32 %v1519_v31, 0.0 }
 0x22e   : > { %v1695_v21 = vpack.c.bf16 %v1653_v19, %v1652_v18 }
 0x22f   : > { %v1694_v22 = vpack.c.bf16 %v1651_v20, %v1650_v14  ;;  %v2901_v23 = vpop.f32.mrb[76].mxu1 }
 0x230   : > { %v1540_v24 = vadd.f32 %v2901_v23, %v3466_v10  ;;  %v1531_v35 = vpop.f32.mrb[77].mxu1 }
 0x231   : > { %v1532_v26 = vadd.f32 %v3466_v10, %v1531_v35  ;;  %v2902_v25 = vpop.f32.mrb[78].mxu1  ;;  %2975 = vmatprep.mubr.bf16.mxu0 %v1694_v22 }
 0x232   : > { %v1543_v1 = vadd.f32 %v2902_v25, %v3466_v10  ;;  %v1534_v28 = vpop.f32.mrb[79].mxu1  ;;  %2976 = vmatmul.mubr.bf16.gmra.mrb[72].mxu0 %v1695_v21  ;;  %v1656_v30 = vmax.f32 %v1540_v24, 0.0 }
 0x233   : > { %v1535_v29 = vadd.f32 %v3466_v10, %v1534_v28  ;;  %v1654_v34 = vmax.f32 %v1532_v26, 0.0 }
 0x234   : > { %v1657_v33 = vmax.f32 %v1543_v1, 0.0 }
 0x235   : > { %v1655_v37 = vmax.f32 %v1535_v29, 0.0  ;;  %v3535_v29 = vld [vmem:[%s3744_s6] ss:$0 sm:$0xff] }
 0x236   : > { %v1697_v36 = vpack.c.bf16 %v1657_v33, %v1656_v30 }
 0x237   : > { %v1696_v39 = vpack.c.bf16 %v1655_v37, %v1654_v34  ;;  %v2905_v51 = vpop.f32.mrb[80].mxu1 }
 0x238   : > { %v1556_v32 = vadd.f32 %v2905_v51, %v3466_v10  ;;  %v1547_v0 = vpop.f32.mrb[81].mxu1 }
 0x239   : > { %v1548_v40 = vadd.f32 %v3466_v10, %v1547_v0  ;;  %v2906_v41 = vpop.f32.mrb[82].mxu1  ;;  %2979 = vmatprep.mubr.bf16.mxu0 %v1696_v39 }
 0x23a   : > { %v1559_v42 = vadd.f32 %v2906_v41, %v3466_v10  ;;  %v1550_v43 = vpop.f32.mrb[83].mxu1  ;;  %2980 = vmatmul.mubr.bf16.gmra.mrb[76].mxu0 %v1697_v36  ;;  %v1660_v45 = vmax.f32 %v1556_v32, 0.0 }
 0x23b   : > { %v1551_v44 = vadd.f32 %v3466_v10, %v1550_v43  ;;  %v1658_v55 = vmax.f32 %v1548_v40, 0.0 }
 0x23c   : > { %v1661_v46 = vmax.f32 %v1559_v42, 0.0 }
 0x23d   : > { %v1659_v47 = vmax.f32 %v1551_v44, 0.0 }
 0x23e   : > { %v1699_v48 = vpack.c.bf16 %v1661_v46, %v1660_v45 }
 0x23f   : > { %v1698_v49 = vpack.c.bf16 %v1659_v47, %v1658_v55  ;;  %v2909_v50 = vpop.f32.mrb[84].mxu1 }
 0x240   : > { %v1572_v16 = vadd.f32 %v2909_v50, %v3466_v10  ;;  %v1563_v27 = vpop.f32.mrb[85].mxu1 }
 0x241   : > { %v1564_v52 = vadd.f32 %v3466_v10, %v1563_v27  ;;  %v2910_v54 = vpop.f32.mrb[86].mxu1  ;;  %2983 = vmatprep.mubr.bf16.mxu0 %v1698_v49 }
 0x242   : > { %v1575_v56 = vadd.f32 %v2910_v54, %v3466_v10  ;;  %v1566_v38 = vpop.f32.mrb[87].mxu1  ;;  %2984 = vmatmul.mubr.bf16.gmra.mrb[80].mxu0 %v1699_v48  ;;  %v1664_v57 = vmax.f32 %v1572_v16, 0.0 }
 0x243   : > { %v1567_v62 = vadd.f32 %v3466_v10, %v1566_v38  ;;  %v1662_v59 = vmax.f32 %v1564_v52, 0.0 }
 0x244   : > { %v1665_v58 = vmax.f32 %v1575_v56, 0.0 }
 0x245   : > { %v1663_v60 = vmax.f32 %v1567_v62, 0.0 }
 0x246   : > { %v1701_v61 = vpack.c.bf16 %v1665_v58, %v1664_v57 }
 0x247   : > { %v1700_v63 = vpack.c.bf16 %v1663_v60, %v1662_v59  ;;  %v2913_v2 = vpop.f32.mrb[88].mxu1 }
 0x248   : > { %v1588_v3 = vadd.f32 %v2913_v2, %v3466_v10  ;;  %v1579_v4 = vpop.f32.mrb[89].mxu1 }
 0x249   : > { %v1580_v53 = vadd.f32 %v3466_v10, %v1579_v4  ;;  %v2914_v5 = vpop.f32.mrb[90].mxu1  ;;  %2987 = vmatprep.mubr.bf16.mxu0 %v1700_v63 }
 0x24a   : > { %v1591_v6 = vadd.f32 %v2914_v5, %v3466_v10  ;;  %v1582_v7 = vpop.f32.mrb[91].mxu1  ;;  %2988 = vmatmul.mubr.bf16.gmra.mrb[84].mxu0 %v1701_v61  ;;  %v1668_v9 = vmax.f32 %v1588_v3, 0.0 }
 0x24b   : > { %v1583_v8 = vadd.f32 %v3466_v10, %v1582_v7  ;;  %v1666_v11 = vmax.f32 %v1580_v53, 0.0 }
 0x24c   : > { %v1669_v13 = vmax.f32 %v1591_v6, 0.0 }
 0x24d   : > { %v1667_v12 = vmax.f32 %v1583_v8, 0.0 }
 0x24e   : > { %v1703_v15 = vpack.c.bf16 %v1669_v13, %v1668_v9 }
 0x24f   : > { %v1702_v17 = vpack.c.bf16 %v1667_v12, %v1666_v11  ;;  %v2917_v31 = vpop.f32.mrb[92].mxu1 }
 0x250   : > { %v1604_v18 = vadd.f32 %v2917_v31, %v3466_v10  ;;  %v1595_v19 = vpop.f32.mrb[93].mxu1 }
 0x251   : > { %v1596_v14 = vadd.f32 %v3466_v10, %v1595_v19  ;;  %v2918_v20 = vpop.f32.mrb[94].mxu1  ;;  %2991 = vmatprep.mubr.bf16.mxu0 %v1702_v17 }
 0x252   : > { %v1607_v21 = vadd.f32 %v2918_v20, %v3466_v10  ;;  %v1598_v22 = vpop.f32.mrb[95].mxu1  ;;  %2992 = vmatmul.mubr.bf16.gmra.mrb[88].mxu0 %v1703_v15  ;;  %v1672_v24 = vmax.f32 %v1604_v18, 0.0 }
 0x253   : > { %v1599_v23 = vadd.f32 %v3466_v10, %v1598_v22  ;;  %v1670_v26 = vmax.f32 %v1596_v14, 0.0 }
 0x254   : > { %v1673_v35 = vmax.f32 %v1607_v21, 0.0 }
 0x255   : > { %v1671_v25 = vmax.f32 %v1599_v23, 0.0 }
 0x256   : > { %v1705_v1 = vpack.c.bf16 %v1673_v35, %v1672_v24 }
 0x257   : > { %v1704_v28 = vpack.c.bf16 %v1671_v25, %v1670_v26 }
 0x259   : > { %2995 = vmatprep.mubr.bf16.mxu0 %v1704_v28 }
 0x25a   : > { %2996 = vmatmul.mubr.bf16.gmra.mrb[92].mxu0 %v1705_v1 }
 0x2b5   : > { %v2937_v30 = vpop.f32.mrb[32].mxu0 }
 0x2b6   : > { %v1820_v33 = vadd.f32 %v2937_v30, %v3535_v29  ;;  %v1811_v34 = vpop.f32.mrb[33].mxu0 }
 0x2b7   : > { %v1812_v10 = vadd.f32 %v3535_v29, %v1811_v34  ;;  %v2938_v37 = vpop.f32.mrb[34].mxu0 }
 0x2b8   : > { %v2068_v36 = vmax.f32 %v1820_v33, 0.0  ;;  %v1823_v39 = vadd.f32 %v2938_v37, %v3535_v29  ;;  %v1814_v51 = vpop.f32.mrb[35].mxu0 }
 0x2b9   : > { %v2066_v32 = vmax.f32 %v1812_v10, 0.0  ;;  %v1815_v0 = vadd.f32 %v3535_v29, %v1814_v51 }
 0x2ba   : > { %2133 = vst.msk [vmem:[%s3542_s30 + $0x10] sm:$0xff] %vm2130_vm0, %v2068_v36  ;;  %v2069_v40 = vmax.f32 %v1823_v39, 0.0 }
 0x2bb   : > { %2131 = vst.msk [vmem:[%s3542_s30] sm:$0xff] %vm2130_vm0, %v2066_v32  ;;  %v2067_v41 = vmax.f32 %v1815_v0, 0.0 }
 0x2bc   : > { %2134 = vst.msk [vmem:[%s3542_s30 + $0x18] sm:$0xff] %vm2130_vm0, %v2069_v40 }
 0x2bd   : > { %2132 = vst.msk [vmem:[%s3542_s30 + $0x8] sm:$0xff] %vm2130_vm0, %v2067_v41  ;;  %v2941_v42 = vpop.f32.mrb[36].mxu0 }
 0x2be   : > { %v1836_v43 = vadd.f32 %v2941_v42, %v3535_v29  ;;  %v1827_v44 = vpop.f32.mrb[37].mxu0 }
 0x2bf   : > { %v1828_v45 = vadd.f32 %v3535_v29, %v1827_v44  ;;  %v2942_v46 = vpop.f32.mrb[38].mxu0 }
 0x2c0   : > { %v2072_v55 = vmax.f32 %v1836_v43, 0.0  ;;  %v1839_v47 = vadd.f32 %v2942_v46, %v3535_v29  ;;  %v1830_v48 = vpop.f32.mrb[39].mxu0 }
 0x2c1   : > { %v2070_v49 = vmax.f32 %v1828_v45, 0.0  ;;  %v1831_v50 = vadd.f32 %v3535_v29, %v1830_v48 }
 0x2c2   : > { %2137 = vst.msk [vmem:[%s3542_s30 + $0x30] sm:$0xff] %vm2130_vm0, %v2072_v55  ;;  %v2073_v16 = vmax.f32 %v1839_v47, 0.0 }
 0x2c3   : > { %2135 = vst.msk [vmem:[%s3542_s30 + $0x20] sm:$0xff] %vm2130_vm0, %v2070_v49  ;;  %v2071_v27 = vmax.f32 %v1831_v50, 0.0 }
 0x2c4   : > { %2138 = vst.msk [vmem:[%s3542_s30 + $0x38] sm:$0xff] %vm2130_vm0, %v2073_v16 }
 0x2c5   : > { %2136 = vst.msk [vmem:[%s3542_s30 + $0x28] sm:$0xff] %vm2130_vm0, %v2071_v27  ;;  %v2945_v52 = vpop.f32.mrb[40].mxu0 }
 0x2c6   : > { %v1852_v54 = vadd.f32 %v2945_v52, %v3535_v29  ;;  %v1843_v56 = vpop.f32.mrb[41].mxu0 }
 0x2c7   : > { %v1844_v38 = vadd.f32 %v3535_v29, %v1843_v56  ;;  %v2946_v62 = vpop.f32.mrb[42].mxu0 }
 0x2c8   : > { %v2076_v57 = vmax.f32 %v1852_v54, 0.0  ;;  %v1855_v58 = vadd.f32 %v2946_v62, %v3535_v29  ;;  %v1846_v59 = vpop.f32.mrb[43].mxu0 }
 0x2c9   : > { %v2074_v60 = vmax.f32 %v1844_v38, 0.0  ;;  %v1847_v61 = vadd.f32 %v3535_v29, %v1846_v59 }
 0x2ca   : > { %2141 = vst.msk [vmem:[%s3542_s30 + $0x50] sm:$0xff] %vm2130_vm0, %v2076_v57  ;;  %v2077_v63 = vmax.f32 %v1855_v58, 0.0 }
 0x2cb   : > { %2139 = vst.msk [vmem:[%s3542_s30 + $0x40] sm:$0xff] %vm2130_vm0, %v2074_v60  ;;  %v2075_v2 = vmax.f32 %v1847_v61, 0.0 }
 0x2cc   : > { %2142 = vst.msk [vmem:[%s3542_s30 + $0x58] sm:$0xff] %vm2130_vm0, %v2077_v63 }
 0x2cd   : > { %2140 = vst.msk [vmem:[%s3542_s30 + $0x48] sm:$0xff] %vm2130_vm0, %v2075_v2  ;;  %v2949_v3 = vpop.f32.mrb[44].mxu0 }
 0x2ce   : > { %v1868_v4 = vadd.f32 %v2949_v3, %v3535_v29  ;;  %v1859_v53 = vpop.f32.mrb[45].mxu0 }
 0x2cf   : > { %v1860_v5 = vadd.f32 %v3535_v29, %v1859_v53  ;;  %v2950_v6 = vpop.f32.mrb[46].mxu0 }
 0x2d0   : > { %v2080_v7 = vmax.f32 %v1868_v4, 0.0  ;;  %v1871_v8 = vadd.f32 %v2950_v6, %v3535_v29  ;;  %v1862_v9 = vpop.f32.mrb[47].mxu0 }
 0x2d1   : > { %v2078_v13 = vmax.f32 %v1860_v5, 0.0  ;;  %v1863_v11 = vadd.f32 %v3535_v29, %v1862_v9 }
 0x2d2   : > { %2145 = vst.msk [vmem:[%s3542_s30 + $0x70] sm:$0xff] %vm2130_vm0, %v2080_v7  ;;  %v2081_v12 = vmax.f32 %v1871_v8, 0.0 }
 0x2d3   : > { %2143 = vst.msk [vmem:[%s3542_s30 + $0x60] sm:$0xff] %vm2130_vm0, %v2078_v13  ;;  %v2079_v15 = vmax.f32 %v1863_v11, 0.0 }
 0x2d4   : > { %2146 = vst.msk [vmem:[%s3542_s30 + $0x78] sm:$0xff] %vm2130_vm0, %v2081_v12 }
 0x2d5   : > { %2144 = vst.msk [vmem:[%s3542_s30 + $0x68] sm:$0xff] %vm2130_vm0, %v2079_v15  ;;  %v2953_v17 = vpop.f32.mrb[48].mxu0 }
 0x2d6   : > { %v1884_v31 = vadd.f32 %v2953_v17, %v3535_v29  ;;  %v1875_v18 = vpop.f32.mrb[49].mxu0 }
 0x2d7   : > { %v1876_v19 = vadd.f32 %v3535_v29, %v1875_v18  ;;  %v2954_v14 = vpop.f32.mrb[50].mxu0 }
 0x2d8   : > { %v2084_v20 = vmax.f32 %v1884_v31, 0.0  ;;  %v1887_v21 = vadd.f32 %v2954_v14, %v3535_v29  ;;  %v1878_v22 = vpop.f32.mrb[51].mxu0 }
 0x2d9   : > { %v2082_v23 = vmax.f32 %v1876_v19, 0.0  ;;  %v1879_v24 = vadd.f32 %v3535_v29, %v1878_v22 }
 0x2da   : > { %2149 = vst.msk [vmem:[%s3542_s30 + $0x90] sm:$0xff] %vm2130_vm0, %v2084_v20  ;;  %v2085_v35 = vmax.f32 %v1887_v21, 0.0 }
 0x2db   : > { %2147 = vst.msk [vmem:[%s3542_s30 + $0x80] sm:$0xff] %vm2130_vm0, %v2082_v23  ;;  %v2083_v26 = vmax.f32 %v1879_v24, 0.0 }
 0x2dc   : > { %2150 = vst.msk [vmem:[%s3542_s30 + $0x98] sm:$0xff] %vm2130_vm0, %v2085_v35 }
 0x2dd   : > { %2148 = vst.msk [vmem:[%s3542_s30 + $0x88] sm:$0xff] %vm2130_vm0, %v2083_v26  ;;  %v2957_v25 = vpop.f32.mrb[52].mxu0 }
 0x2de   : > { %v1900_v1 = vadd.f32 %v2957_v25, %v3535_v29  ;;  %v1891_v28 = vpop.f32.mrb[53].mxu0 }
 0x2df   : > { %v1892_v30 = vadd.f32 %v3535_v29, %v1891_v28  ;;  %v2958_v33 = vpop.f32.mrb[54].mxu0 }
 0x2e0   : > { %v2088_v34 = vmax.f32 %v1900_v1, 0.0  ;;  %v1903_v10 = vadd.f32 %v2958_v33, %v3535_v29  ;;  %v1894_v37 = vpop.f32.mrb[55].mxu0 }
 0x2e1   : > { %v2086_v36 = vmax.f32 %v1892_v30, 0.0  ;;  %v1895_v39 = vadd.f32 %v3535_v29, %v1894_v37 }
 0x2e2   : > { %2153 = vst.msk [vmem:[%s3542_s30 + $0xb0] sm:$0xff] %vm2130_vm0, %v2088_v34  ;;  %v2089_v51 = vmax.f32 %v1903_v10, 0.0 }
 0x2e3   : > { %2151 = vst.msk [vmem:[%s3542_s30 + $0xa0] sm:$0xff] %vm2130_vm0, %v2086_v36  ;;  %v2087_v32 = vmax.f32 %v1895_v39, 0.0 }
 0x2e4   : > { %2154 = vst.msk [vmem:[%s3542_s30 + $0xb8] sm:$0xff] %vm2130_vm0, %v2089_v51 }
 0x2e5   : > { %2152 = vst.msk [vmem:[%s3542_s30 + $0xa8] sm:$0xff] %vm2130_vm0, %v2087_v32  ;;  %v2961_v0 = vpop.f32.mrb[56].mxu0 }
 0x2e6   : > { %v1916_v40 = vadd.f32 %v2961_v0, %v3535_v29  ;;  %v1907_v41 = vpop.f32.mrb[57].mxu0 }
 0x2e7   : > { %v1908_v42 = vadd.f32 %v3535_v29, %v1907_v41  ;;  %v2962_v43 = vpop.f32.mrb[58].mxu0 }
 0x2e8   : > { %v2092_v44 = vmax.f32 %v1916_v40, 0.0  ;;  %v1919_v45 = vadd.f32 %v2962_v43, %v3535_v29  ;;  %v1910_v46 = vpop.f32.mrb[59].mxu0 }
 0x2e9   : > { %v2090_v55 = vmax.f32 %v1908_v42, 0.0  ;;  %v1911_v47 = vadd.f32 %v3535_v29, %v1910_v46 }
 0x2ea   : > { %2157 = vst.msk [vmem:[%s3542_s30 + $0xd0] sm:$0xff] %vm2130_vm0, %v2092_v44  ;;  %v2093_v48 = vmax.f32 %v1919_v45, 0.0 }
 0x2eb   : > { %2155 = vst.msk [vmem:[%s3542_s30 + $0xc0] sm:$0xff] %vm2130_vm0, %v2090_v55  ;;  %v2091_v49 = vmax.f32 %v1911_v47, 0.0 }
 0x2ec   : > { %2158 = vst.msk [vmem:[%s3542_s30 + $0xd8] sm:$0xff] %vm2130_vm0, %v2093_v48 }
 0x2ed   : > { %2156 = vst.msk [vmem:[%s3542_s30 + $0xc8] sm:$0xff] %vm2130_vm0, %v2091_v49  ;;  %v2965_v50 = vpop.f32.mrb[60].mxu0 }
 0x2ee   : > { %v1932_v16 = vadd.f32 %v2965_v50, %v3535_v29  ;;  %v1923_v27 = vpop.f32.mrb[61].mxu0 }
 0x2ef   : > { %v1924_v52 = vadd.f32 %v3535_v29, %v1923_v27  ;;  %v2966_v54 = vpop.f32.mrb[62].mxu0 }
 0x2f0   : > { %v2096_v56 = vmax.f32 %v1932_v16, 0.0  ;;  %v1935_v38 = vadd.f32 %v2966_v54, %v3535_v29  ;;  %v1926_v62 = vpop.f32.mrb[63].mxu0 }
 0x2f1   : > { %v2094_v57 = vmax.f32 %v1924_v52, 0.0  ;;  %v1927_v58 = vadd.f32 %v3535_v29, %v1926_v62 }
 0x2f2   : > { %2161 = vst.msk [vmem:[%s3542_s30 + $0xf0] sm:$0xff] %vm2130_vm0, %v2096_v56  ;;  %v2097_v59 = vmax.f32 %v1935_v38, 0.0 }
 0x2f3   : > { %2159 = vst.msk [vmem:[%s3542_s30 + $0xe0] sm:$0xff] %vm2130_vm0, %v2094_v57  ;;  %v2095_v60 = vmax.f32 %v1927_v58, 0.0 }
 0x2f4   : > { %2162 = vst.msk [vmem:[%s3542_s30 + $0xf8] sm:$0xff] %vm2130_vm0, %v2097_v59 }
 0x2f5   : > { %2160 = vst.msk [vmem:[%s3542_s30 + $0xe8] sm:$0xff] %vm2130_vm0, %v2095_v60  ;;  %v2969_v61 = vpop.f32.mrb[64].mxu0 }
 0x2f6   : > { %v1948_v63 = vadd.f32 %v2969_v61, %v3535_v29  ;;  %v1939_v2 = vpop.f32.mrb[65].mxu0 }
 0x2f7   : > { %v1940_v3 = vadd.f32 %v3535_v29, %v1939_v2  ;;  %v2970_v4 = vpop.f32.mrb[66].mxu0 }
 0x2f8   : > { %v2100_v53 = vmax.f32 %v1948_v63, 0.0  ;;  %v1951_v5 = vadd.f32 %v2970_v4, %v3535_v29  ;;  %v1942_v6 = vpop.f32.mrb[67].mxu0 }
 0x2f9   : > { %v2098_v7 = vmax.f32 %v1940_v3, 0.0  ;;  %v1943_v8 = vadd.f32 %v3535_v29, %v1942_v6 }
 0x2fa   : > { %2165 = vst.msk [vmem:[%s3542_s30 + $0x110] sm:$0xff] %vm2130_vm0, %v2100_v53  ;;  %v2101_v9 = vmax.f32 %v1951_v5, 0.0 }
 0x2fb   : > { %2163 = vst.msk [vmem:[%s3542_s30 + $0x100] sm:$0xff] %vm2130_vm0, %v2098_v7  ;;  %v2099_v13 = vmax.f32 %v1943_v8, 0.0 }
 0x2fc   : > { %2166 = vst.msk [vmem:[%s3542_s30 + $0x118] sm:$0xff] %vm2130_vm0, %v2101_v9 }
 0x2fd   : > { %2164 = vst.msk [vmem:[%s3542_s30 + $0x108] sm:$0xff] %vm2130_vm0, %v2099_v13  ;;  %v2973_v11 = vpop.f32.mrb[68].mxu0 }
 0x2fe   : > { %v1964_v12 = vadd.f32 %v2973_v11, %v3535_v29  ;;  %v1955_v15 = vpop.f32.mrb[69].mxu0 }
 0x2ff   : > { %v1956_v17 = vadd.f32 %v3535_v29, %v1955_v15  ;;  %v2974_v31 = vpop.f32.mrb[70].mxu0 }
 0x300   : > { %v2104_v18 = vmax.f32 %v1964_v12, 0.0  ;;  %v1967_v19 = vadd.f32 %v2974_v31, %v3535_v29  ;;  %v1958_v14 = vpop.f32.mrb[71].mxu0 }
 0x301   : > { %v2102_v20 = vmax.f32 %v1956_v17, 0.0  ;;  %v1959_v21 = vadd.f32 %v3535_v29, %v1958_v14 }
 0x302   : > { %2169 = vst.msk [vmem:[%s3542_s30 + $0x130] sm:$0xff] %vm2130_vm0, %v2104_v18  ;;  %v2105_v22 = vmax.f32 %v1967_v19, 0.0 }
 0x303   : > { %2167 = vst.msk [vmem:[%s3542_s30 + $0x120] sm:$0xff] %vm2130_vm0, %v2102_v20  ;;  %v2103_v23 = vmax.f32 %v1959_v21, 0.0 }
 0x304   : > { %2170 = vst.msk [vmem:[%s3542_s30 + $0x138] sm:$0xff] %vm2130_vm0, %v2105_v22 }
 0x305   : > { %2168 = vst.msk [vmem:[%s3542_s30 + $0x128] sm:$0xff] %vm2130_vm0, %v2103_v23  ;;  %v2977_v24 = vpop.f32.mrb[72].mxu0 }
 0x306   : > { %v1980_v35 = vadd.f32 %v2977_v24, %v3535_v29  ;;  %v1971_v26 = vpop.f32.mrb[73].mxu0 }
 0x307   : > { %v1972_v25 = vadd.f32 %v3535_v29, %v1971_v26  ;;  %v2978_v1 = vpop.f32.mrb[74].mxu0 }
 0x308   : > { %v2108_v28 = vmax.f32 %v1980_v35, 0.0  ;;  %v1983_v30 = vadd.f32 %v2978_v1, %v3535_v29  ;;  %v1974_v33 = vpop.f32.mrb[75].mxu0 }
 0x309   : > { %v2106_v34 = vmax.f32 %v1972_v25, 0.0  ;;  %v1975_v10 = vadd.f32 %v3535_v29, %v1974_v33 }
 0x30a   : > { %2173 = vst.msk [vmem:[%s3542_s30 + $0x150] sm:$0xff] %vm2130_vm0, %v2108_v28  ;;  %v2109_v37 = vmax.f32 %v1983_v30, 0.0 }
 0x30b   : > { %2171 = vst.msk [vmem:[%s3542_s30 + $0x140] sm:$0xff] %vm2130_vm0, %v2106_v34  ;;  %v2107_v36 = vmax.f32 %v1975_v10, 0.0 }
 0x30c   : > { %2174 = vst.msk [vmem:[%s3542_s30 + $0x158] sm:$0xff] %vm2130_vm0, %v2109_v37 }
 0x30d   : > { %2172 = vst.msk [vmem:[%s3542_s30 + $0x148] sm:$0xff] %vm2130_vm0, %v2107_v36  ;;  %v2981_v39 = vpop.f32.mrb[76].mxu0 }
 0x30e   : > { %v1996_v51 = vadd.f32 %v2981_v39, %v3535_v29  ;;  %v1987_v32 = vpop.f32.mrb[77].mxu0 }
 0x30f   : > { %v1988_v0 = vadd.f32 %v3535_v29, %v1987_v32  ;;  %v2982_v40 = vpop.f32.mrb[78].mxu0 }
 0x310   : > { %v2112_v41 = vmax.f32 %v1996_v51, 0.0  ;;  %v1999_v42 = vadd.f32 %v2982_v40, %v3535_v29  ;;  %v1990_v43 = vpop.f32.mrb[79].mxu0 }
 0x311   : > { %v2110_v44 = vmax.f32 %v1988_v0, 0.0  ;;  %v1991_v45 = vadd.f32 %v3535_v29, %v1990_v43 }
 0x312   : > { %2177 = vst.msk [vmem:[%s3542_s30 + $0x170] sm:$0xff] %vm2130_vm0, %v2112_v41  ;;  %v2113_v46 = vmax.f32 %v1999_v42, 0.0 }
 0x313   : > { %2175 = vst.msk [vmem:[%s3542_s30 + $0x160] sm:$0xff] %vm2130_vm0, %v2110_v44  ;;  %v2111_v55 = vmax.f32 %v1991_v45, 0.0 }
 0x314   : > { %2178 = vst.msk [vmem:[%s3542_s30 + $0x178] sm:$0xff] %vm2130_vm0, %v2113_v46 }
 0x315   : > { %2176 = vst.msk [vmem:[%s3542_s30 + $0x168] sm:$0xff] %vm2130_vm0, %v2111_v55  ;;  %v2985_v47 = vpop.f32.mrb[80].mxu0 }
 0x316   : > { %v2012_v48 = vadd.f32 %v2985_v47, %v3535_v29  ;;  %v2003_v49 = vpop.f32.mrb[81].mxu0 }
 0x317   : > { %v2004_v50 = vadd.f32 %v3535_v29, %v2003_v49  ;;  %v2986_v16 = vpop.f32.mrb[82].mxu0 }
 0x318   : > { %v2116_v27 = vmax.f32 %v2012_v48, 0.0  ;;  %v2015_v52 = vadd.f32 %v2986_v16, %v3535_v29  ;;  %v2006_v54 = vpop.f32.mrb[83].mxu0 }
 0x319   : > { %v2114_v56 = vmax.f32 %v2004_v50, 0.0  ;;  %v2007_v38 = vadd.f32 %v3535_v29, %v2006_v54 }
 0x31a   : > { %2181 = vst.msk [vmem:[%s3542_s30 + $0x190] sm:$0xff] %vm2130_vm0, %v2116_v27  ;;  %v2117_v62 = vmax.f32 %v2015_v52, 0.0 }
 0x31b   : > { %2179 = vst.msk [vmem:[%s3542_s30 + $0x180] sm:$0xff] %vm2130_vm0, %v2114_v56  ;;  %v2115_v57 = vmax.f32 %v2007_v38, 0.0 }
 0x31c   : > { %2182 = vst.msk [vmem:[%s3542_s30 + $0x198] sm:$0xff] %vm2130_vm0, %v2117_v62 }
 0x31d   : > { %2180 = vst.msk [vmem:[%s3542_s30 + $0x188] sm:$0xff] %vm2130_vm0, %v2115_v57  ;;  %v2989_v58 = vpop.f32.mrb[84].mxu0 }
 0x31e   : > { %v2028_v59 = vadd.f32 %v2989_v58, %v3535_v29  ;;  %v2019_v60 = vpop.f32.mrb[85].mxu0 }
 0x31f   : > { %v2020_v61 = vadd.f32 %v3535_v29, %v2019_v60  ;;  %v2990_v63 = vpop.f32.mrb[86].mxu0 }
 0x320   : > { %v2120_v2 = vmax.f32 %v2028_v59, 0.0  ;;  %v2031_v3 = vadd.f32 %v2990_v63, %v3535_v29  ;;  %v2022_v4 = vpop.f32.mrb[87].mxu0 }
 0x321   : > { %v2118_v53 = vmax.f32 %v2020_v61, 0.0  ;;  %v2023_v5 = vadd.f32 %v3535_v29, %v2022_v4 }
 0x322   : > { %2185 = vst.msk [vmem:[%s3542_s30 + $0x1b0] sm:$0xff] %vm2130_vm0, %v2120_v2  ;;  %v2121_v6 = vmax.f32 %v2031_v3, 0.0 }
 0x323   : > { %2183 = vst.msk [vmem:[%s3542_s30 + $0x1a0] sm:$0xff] %vm2130_vm0, %v2118_v53  ;;  %v2119_v7 = vmax.f32 %v2023_v5, 0.0 }
 0x324   : > { %2186 = vst.msk [vmem:[%s3542_s30 + $0x1b8] sm:$0xff] %vm2130_vm0, %v2121_v6 }
 0x325   : > { %2184 = vst.msk [vmem:[%s3542_s30 + $0x1a8] sm:$0xff] %vm2130_vm0, %v2119_v7  ;;  %v2993_v8 = vpop.f32.mrb[88].mxu0 }
 0x326   : > { %v2044_v9 = vadd.f32 %v2993_v8, %v3535_v29  ;;  %v2035_v13 = vpop.f32.mrb[89].mxu0 }
 0x327   : > { %v2036_v11 = vadd.f32 %v3535_v29, %v2035_v13  ;;  %v2994_v12 = vpop.f32.mrb[90].mxu0 }
 0x328   : > { %v2124_v15 = vmax.f32 %v2044_v9, 0.0  ;;  %v2047_v17 = vadd.f32 %v2994_v12, %v3535_v29  ;;  %v2038_v31 = vpop.f32.mrb[91].mxu0 }
 0x329   : > { %v2122_v18 = vmax.f32 %v2036_v11, 0.0  ;;  %v2039_v19 = vadd.f32 %v3535_v29, %v2038_v31 }
 0x32a   : > { %2189 = vst.msk [vmem:[%s3542_s30 + $0x1d0] sm:$0xff] %vm2130_vm0, %v2124_v15  ;;  %v2125_v14 = vmax.f32 %v2047_v17, 0.0 }
 0x32b   : > { %2187 = vst.msk [vmem:[%s3542_s30 + $0x1c0] sm:$0xff] %vm2130_vm0, %v2122_v18  ;;  %v2123_v20 = vmax.f32 %v2039_v19, 0.0 }
 0x32c   : > { %2190 = vst.msk [vmem:[%s3542_s30 + $0x1d8] sm:$0xff] %vm2130_vm0, %v2125_v14 }
 0x32d   : > { %2188 = vst.msk [vmem:[%s3542_s30 + $0x1c8] sm:$0xff] %vm2130_vm0, %v2123_v20  ;;  %v2997_v21 = vpop.f32.mrb[92].mxu0 }
 0x32e   : > { %v2060_v22 = vadd.f32 %v2997_v21, %v3535_v29  ;;  %v2051_v23 = vpop.f32.mrb[93].mxu0 }
 0x32f   : > { %v2052_v24 = vadd.f32 %v3535_v29, %v2051_v23  ;;  %v2998_v35 = vpop.f32.mrb[94].mxu0 }
 0x330   : > { %v2128_v26 = vmax.f32 %v2060_v22, 0.0  ;;  %v2063_v25 = vadd.f32 %v2998_v35, %v3535_v29  ;;  %v2054_v1 = vpop.f32.mrb[95].mxu0 }
 0x331   : > { %v2126_v28 = vmax.f32 %v2052_v24, 0.0  ;;  %v2055_v30 = vadd.f32 %v3535_v29, %v2054_v1 }
 0x332   : > { %2193 = vst.msk [vmem:[%s3542_s30 + $0x1f0] sm:$0xff] %vm2130_vm0, %v2128_v26  ;;  %v2129_v33 = vmax.f32 %v2063_v25, 0.0 }
 0x333   : > { %2191 = vst.msk [vmem:[%s3542_s30 + $0x1e0] sm:$0xff] %vm2130_vm0, %v2126_v28  ;;  %v2127_v34 = vmax.f32 %v2055_v30, 0.0 }
 0x334   : > { %2194 = vst.msk [vmem:[%s3542_s30 + $0x1f8] sm:$0xff] %vm2130_vm0, %v2129_v33 }
 0x335   : > { %2192 = vst.msk [vmem:[%s3542_s30 + $0x1e8] sm:$0xff] %vm2130_vm0, %v2127_v34 }
 0x336 PF: > { %s17_s24 = sadd.s32 1, %s3053_s24  }
 0x337   : > { %p14_p4 = scmp.ge.s32.totalorder %s17_s24, 4  }
 0x339   :  { %16 = sbr.rel (!%p14_p4) target bundleno = 1 (0x1), region = 83 }

</bundles_post_ra>
